<compile_context>
chip_gen: v7x
topology: tpu7x:2x2x1
jax: 0.10.0
libtpu: 0.0.40
codegen_flags: <defaults>
</compile_context>

<pallas_src>
import functools

import jax
import jax.numpy as jnp
from jax import lax
from jax.experimental import pallas as pl
from jax.experimental.pallas import tpu as pltpu


# ----------------------------------------------------------------------------
# Portable in-kernel RNG: integer hash -> uniform -> inverse normal CDF.
# ----------------------------------------------------------------------------
_MUL1 = 0x632BE5AB   # odd, < 2**31
_ADD1 = 0x7F4A7C15   # < 2**31
_STEP = 0x51F2D3AD   # odd, < 2**31


def _hash_i32(x):
    """2-round avalanche hash on int32 (works on scalars and arrays)."""
    def sr16(v):  # logical right shift by 16 for int32
        return (v >> 16) & jnp.int32(0xFFFF)
    x = jnp.bitwise_xor(x, sr16(x)) * jnp.int32(0x45D9F3B)
    x = jnp.bitwise_xor(x, sr16(x)) * jnp.int32(0x45D9F3B)
    x = jnp.bitwise_xor(x, sr16(x))
    return x


def _mix32(h, v):
    """Fold integer v into hash state h (decorrelates nearby grid indices)."""
    return _hash_i32(jnp.bitwise_xor(h, v * jnp.int32(_MUL1) + jnp.int32(_ADD1)))


def _probit(p):
    """Acklam's rational approximation of the inverse normal CDF, branchless."""
    a0, a1, a2, a3, a4, a5 = (-3.969683028665376e+01, 2.209460984245205e+02,
                              -2.759285104469687e+02, 1.383577518672690e+02,
                              -3.066479806614716e+01, 2.506628277459239e+00)
    b0, b1, b2, b3, b4 = (-5.447609879822406e+01, 1.615858368580409e+02,
                          -1.556989798598866e+02, 6.680131188771972e+01,
                          -1.328068155288572e+01)
    c0, c1, c2, c3, c4, c5 = (-7.784894002430293e-03, -3.223964580411365e-01,
                              -2.400758277161838e+00, -2.549732539343734e+00,
                              4.374664141464968e+00, 2.938163982698783e+00)
    d0, d1, d2, d3 = (7.784695709041462e-03, 3.224671290700398e-01,
                      2.445134137142996e+00, 3.754408661907416e+00)
    plow = 0.02425

    # Central region.
    q = p - 0.5
    r = q * q
    x_c = ((((((a0 * r + a1) * r + a2) * r + a3) * r + a4) * r + a5) * q /
           (((((b0 * r + b1) * r + b2) * r + b3) * r + b4) * r + 1.0))

    # Tails (evaluated with the smaller tail mass; sign fixed afterwards).
    pt = jnp.minimum(p, 1.0 - p)                      # in (0, 0.5]
    s = jnp.sqrt(-2.0 * jnp.log(pt))
    x_t = (((((c0 * s + c1) * s + c2) * s + c3) * s + c4) * s + c5) / \
          ((((d0 * s + d1) * s + d2) * s + d3) * s + 1.0)
    x_t = jnp.where(p < 0.5, x_t, -x_t)

    return jnp.where(jnp.abs(q) <= (0.5 - plow), x_c, x_t)


# ----------------------------------------------------------------------------
# Kernel.
# ----------------------------------------------------------------------------
def _ncsn_kernel(alpha_ref,        # SMEM (L,)  f32   alphas[i]
                 alpha_half_ref,   # SMEM (L,)  f32   alphas[i] / 2
                 seed_ref,         # SMEM (1,)  i32   base RNG seed
                 nscale_ref,       # SMEM (1,)  f32   noise scale (1.0 run, 0.0 check)
                 x0_ref,           # VMEM (C, Mt)     initial x_T tile (pixels on lanes)
                 w1t_ref,          # VMEM (HID, C)    W1^T (resident)
                 w2t_ref,          # VMEM (C, HID)    W2^T (resident)
                 b1e_ref,          # VMEM (L, HID, 1) b1 + emb table (resident)
                 b2_ref,           # VMEM (C, 1)      (resident)
                 o_ref,            # VMEM (C, Mt)     carried state / output tile
                 *, n_steps, unroll, hidden_dtype):
    b = pl.program_id(0)           # batch index                ("parallel")
    m = pl.program_id(1)           # pixel-tile index           ("parallel")
    i = pl.program_id(2)           # sigma level == "labels"    ("arbitrary")

    # Prime the resident state tile once per (batch, tile).
    @pl.when(i == 0)
    def _():
        o_ref[...] = x0_ref[...]

    C, Mt = o_ref.shape
    HID = w1t_ref.shape[0]

    alpha = alpha_ref[i]
    alpha_half = alpha_half_ref[i]
    noise_coef = alpha * nscale_ref[0]

    # --- level constants, hoisted out of the step loop (no broadcast CSE). ---
    w1t = w1t_ref[...]                                            # (HID, C) f32
    w2t_h = w2t_ref[...].astype(hidden_dtype)                     # (C, HID)
    b1e_b = jnp.broadcast_to(b1e_ref[i].astype(hidden_dtype), (HID, Mt))
    b2_b = jnp.broadcast_to(b2_ref[...], (C, Mt))
    alpha_half_b = jnp.broadcast_to(alpha_half, (C, Mt))
    noise_b = jnp.broadcast_to(noise_coef, (C, Mt))

    # --- RNG stream, unique per (batch, tile, level); per-element hash hoisted.
    stream = seed_ref[0]
    stream = _mix32(stream, b)
    stream = _mix32(stream, m)
    stream = _mix32(stream, i)
    row = lax.broadcasted_iota(jnp.int32, (C, Mt), 0)
    col = lax.broadcasted_iota(jnp.int32, (C, Mt), 1)
    elem_h = _hash_i32(row * jnp.int32(Mt) + col)

    def step(t, x):                # x: (C, Mt) f32, lane-dense on pixels
        # score(x, labels=i): per-pixel channel MLP (two 1x1 convs).
        # TODO(synk): torch nn.GELU defaults to exact erf; tanh approximation
        # is used here (the score net is synthetic anyway).
        h = jnp.dot(w1t, x, preferred_element_type=jnp.float32)
        h = jax.nn.gelu(h.astype(hidden_dtype) + b1e_b, approximate=True)
        s = jnp.dot(w2t_h, h, preferred_element_type=jnp.float32) + b2_b

        # randn_like(x): counter hash -> uniform (0,1) -> inverse normal CDF.
        step_key = _hash_i32(stream + t * jnp.int32(_STEP))
        bits = _hash_i32(jnp.bitwise_xor(elem_h, step_key))
        v = ((bits & jnp.int32(0x7FFFFFFF)) >> 8).astype(jnp.float32)  # [0, 2^23)
        p = (v + 0.5) * (1.0 / float(1 << 23))                         # (0, 1)
        z = _probit(p)

        # x <- x + alpha * score / 2 + alpha * noise  (exactly as the module:
        # the noise is scaled by alpha, not sqrt(2*alpha)).
        return x + alpha_half_b * s + noise_b * z

    x = lax.fori_loop(0, n_steps, step, o_ref[...].astype(jnp.float32),
                      unroll=unroll)
    o_ref[...] = x.astype(o_ref.dtype)


# ----------------------------------------------------------------------------
# Wrapper.
# ----------------------------------------------------------------------------
def ncsn_sample(x_nchw, sigmas, alphas, params, emb, n_steps_each, *,
                seed=0, noise_scale=1.0, hw_tile=None, hidden_dtype=jnp.float32):
    """Full annealed-Langevin loop inside one pallas_call.

    x_nchw : (B, C, H, W) f32
    sigmas : (L,) f32 (only enumerated in the torch forward; alphas drive it)
    alphas : (L,) f32
    params : dict with w1 (C, HID), b1 (HID,), w2 (HID, C), b2 (C,)
    emb    : (L, HID) f32 sigma-index embedding added to the hidden layer

    hidden_dtype=jnp.bfloat16 enables the bf16 hidden path (gelu + 2nd matmul)
    for v6e/v7x; the default f32 is the safe choice on v5e.
    """
    del sigmas  # enumerated only; the update is driven by alphas
    B, C, H, W = x_nchw.shape
    HW = H * W
    L = int(alphas.shape[0])
    HID = params["w1"].shape[1]
    assert emb.shape == (L, HID)
    assert HW % 128 == 0, "H*W must be a multiple of 128 (lane width)"

    if hw_tile is None:
        # Largest 128-multiple divisor of HW, capped at 2048 lanes per tile.
        hw_tile = 128
        for cand in range(128, min(HW, 2048) + 1, 128):
            if HW % cand == 0:
                hw_tile = cand
    assert HW % hw_tile == 0 and hw_tile % 128 == 0

    # Free reshape (no transpose): pixels on the fast lane axis per batch item.
    x = jnp.asarray(x_nchw, jnp.float32).reshape(B, C, HW)

    # Pre-transposed weights and the per-level folded bias table.
    w1t = jnp.asarray(params["w1"], jnp.float32).T                    # (HID, C)
    w2t = jnp.asarray(params["w2"], jnp.float32).T                    # (C, HID)
    b1e_tab = (jnp.asarray(params["b1"], jnp.float32)[None, :]
               + jnp.asarray(emb, jnp.float32))[:, :, None]           # (L, HID, 1)
    b2 = jnp.asarray(params["b2"], jnp.float32)[:, None]              # (C, 1)

    alphas_f32 = jnp.asarray(alphas, jnp.float32)
    alpha_half = 0.5 * alphas_f32
    seed_arr = jnp.array([seed], jnp.int32)
    nscale = jnp.array([noise_scale], jnp.float32)

    n_steps = int(n_steps_each)
    unroll = max(1, min(n_steps, 8))

    grid = (B, HW // hw_tile, L)

    grid_spec = pltpu.PrefetchScalarGridSpec(
        num_scalar_prefetch=0,
        grid=grid,
        in_specs=[
            pl.BlockSpec(memory_space=pltpu.SMEM),                        # alphas
            pl.BlockSpec(memory_space=pltpu.SMEM),                        # alphas/2
            pl.BlockSpec(memory_space=pltpu.SMEM),                        # seed
            pl.BlockSpec(memory_space=pltpu.SMEM),                        # noise scale
            pl.BlockSpec((None, C, hw_tile), lambda b, m, i: (b, 0, m)),  # x0 tile
            pl.BlockSpec((HID, C), lambda b, m, i: (0, 0)),               # W1^T
            pl.BlockSpec((C, HID), lambda b, m, i: (0, 0)),               # W2^T
            pl.BlockSpec((L, HID, 1), lambda b, m, i: (0, 0, 0)),         # b1+emb table
            pl.BlockSpec((C, 1), lambda b, m, i: (0, 0)),                 # b2
        ],
        out_specs=pl.BlockSpec((None, C, hw_tile), lambda b, m, i: (b, 0, m)),
    )

    out = pl.pallas_call(
        functools.partial(_ncsn_kernel, n_steps=n_steps, unroll=unroll,
                          hidden_dtype=hidden_dtype),
        out_shape=jax.ShapeDtypeStruct((B, C, HW), jnp.float32),
        grid_spec=grid_spec,
        input_output_aliases={4: 0},   # donate x into the output buffer
        compiler_params=pltpu.CompilerParams(
            dimension_semantics=("parallel", "parallel", "arbitrary"),
            vmem_limit_bytes=32 * 1024 * 1024,
        ),
    )(alphas_f32, alpha_half, seed_arr, nscale, x, w1t, w2t, b1e_tab, b2)

    return out.reshape(B, C, H, W)


# ----------------------------------------------------------------------------
# Pure-JAX reference of the deterministic part (noise_scale = 0).
# ----------------------------------------------------------------------------
def reference_ncsn_drift(x_nchw, alphas, params, emb, n_steps_each):
    B, C, H, W = x_nchw.shape
    x = jnp.asarray(x_nchw, jnp.float32).reshape(B, C, H * W)
    w1t = params["w1"].T                          # (HID, C)
    w2t = params["w2"].T                          # (C, HID)
    for i in range(alphas.shape[0]):
        b1e = (params["b1"] + emb[i])[None, :, None]
        for _ in range(n_steps_each):
            h = jax.nn.gelu(jnp.einsum("hc,bcm->bhm", w1t, x) + b1e,
                            approximate=True)
            s = jnp.einsum("ch,bhm->bcm", w2t, h) + params["b2"][None, :, None]
            x = x + 0.5 * alphas[i] * s
    return x.reshape(B, C, H, W)


if __name__ == "__main__":
    # Small, deterministic configuration.
    B, C, H, W = 2, 4, 16, 16
    HID = 32
    L = 4                 # number of sigma levels
    N_STEPS_EACH = 3

    key = jax.random.PRNGKey(0)
    k_x, k_w1, k_b1, k_w2, k_b2, k_emb = jax.random.split(key, 6)

    # NCSN-style schedules (sigmas only enumerated in forward; alphas used).
    sigmas = jnp.geomspace(0.5, 0.05, L).astype(jnp.float32)
    alphas = (2e-3 * (sigmas / sigmas[-1]) ** 2).astype(jnp.float32)

    # Deterministic synthetic score-network parameters.
    params = {
        "w1": (0.1 * jax.random.normal(k_w1, (C, HID))).astype(jnp.float32),
        "b1": (0.05 * jax.random.normal(k_b1, (HID,))).astype(jnp.float32),
        "w2": (0.1 * jax.random.normal(k_w2, (HID, C))).astype(jnp.float32),
        "b2": (0.05 * jax.random.normal(k_b2, (C,))).astype(jnp.float32),
    }
    emb = (0.1 * jax.random.normal(k_emb, (L, HID))).astype(jnp.float32)

    x_T = jax.random.normal(k_x, (B, C, H, W)).astype(jnp.float32)

    # 1) Full sampler (on-chip Gaussian noise mirroring torch.randn_like).
    out = ncsn_sample(x_T, sigmas, alphas, params, emb, N_STEPS_EACH,
                      seed=1234, noise_scale=1.0)
    out = jax.block_until_ready(out)
    assert out.shape == (B, C, H, W)
    assert bool(jnp.all(jnp.isfinite(out)))

    # 2) Deterministic check: with the noise term off, the kernel must
    #    reproduce the pure-JAX Langevin drift (torch.randn_like's RNG stream
    #    itself cannot be bit-matched in any framework).
    out_det = jax.block_until_ready(
        ncsn_sample(x_T, sigmas, alphas, params, emb, N_STEPS_EACH,
                    seed=1234, noise_scale=0.0))
    ref_det = jax.block_until_ready(
        reference_ncsn_drift(x_T, alphas, params, emb, N_STEPS_EACH))
    max_err = float(jnp.max(jnp.abs(out_det - ref_det)))
    assert bool(jnp.allclose(out_det, ref_det, atol=5e-3, rtol=5e-3)), max_err

    # 3) The stochastic path must actually inject noise.
    assert not bool(jnp.allclose(out, out_det, atol=1e-3))

    print("KERNEL_OK")
</pallas_src>

<mosaic_0001>
module attributes {stable_mosaic.version = 11 : i64} {
  func.func @_ncsn_kernel(%arg0: i32, %arg1: i32, %arg2: i32, %arg3: memref<4xf32, #tpu.memory_space<smem>>, %arg4: memref<4xf32, #tpu.memory_space<smem>>, %arg5: memref<1xi32, #tpu.memory_space<smem>>, %arg6: memref<1xf32, #tpu.memory_space<smem>>, %arg7: memref<1x4x256xf32, #tpu.memory_space<vmem>>, %arg8: memref<32x4xf32, #tpu.memory_space<vmem>>, %arg9: memref<4x32xf32, #tpu.memory_space<vmem>>, %arg10: memref<4x32x1xf32, #tpu.memory_space<vmem>>, %arg11: memref<4x1xf32, #tpu.memory_space<vmem>>, %arg12: memref<1x4x256xf32, #tpu.memory_space<vmem>>) attributes {dimension_semantics = [#tpu.dimension_semantics<parallel>, #tpu.dimension_semantics<parallel>, #tpu.dimension_semantics<arbitrary>], iteration_bounds = array<i64: 2, 1, 4>, scalar_prefetch = 0 : i64, scratch_operands = 0 : i64, tpu.core_type = #tpu.core_type<tc>, window_params = [{transform_indices = @transform_0, window_bounds = array<i64: 4>}, {transform_indices = @transform_1, window_bounds = array<i64: 4>}, {transform_indices = @transform_2, window_bounds = array<i64: 1>}, {transform_indices = @transform_3, window_bounds = array<i64: 1>}, {transform_indices = @transform_4, window_bounds = array<i64: 1, 4, 256>}, {pipeline_mode = #tpu.pipeline_mode<synchronous>, transform_indices = @transform_5, window_bounds = array<i64: 32, 4>}, {pipeline_mode = #tpu.pipeline_mode<synchronous>, transform_indices = @transform_6, window_bounds = array<i64: 4, 32>}, {pipeline_mode = #tpu.pipeline_mode<synchronous>, transform_indices = @transform_7, window_bounds = array<i64: 4, 32, 1>}, {pipeline_mode = #tpu.pipeline_mode<synchronous>, transform_indices = @transform_8, window_bounds = array<i64: 4, 1>}, {transform_indices = @transform_9, window_bounds = array<i64: 1, 4, 256>}]} {
    %c0_i32 = arith.constant 0 : i32
    %0 = arith.cmpi eq, %arg2, %c0_i32 : i32
    %1 = arith.extui %0 : i1 to i32
    %c0_i32_0 = arith.constant 0 : i32
    %2 = arith.cmpi ne, %1, %c0_i32_0 : i32
    scf.if %2 {
      %c0_214 = arith.constant 0 : index
      %c0_215 = arith.constant 0 : index
      %c0_216 = arith.constant 0 : index
      %534 = vector.load %arg7[%c0_214, %c0_215, %c0_216] : memref<1x4x256xf32, #tpu.memory_space<vmem>>, vector<1x4x256xf32>
      %535 = vector.shape_cast %534 : vector<1x4x256xf32> to vector<4x256xf32>
      %c0_217 = arith.constant 0 : index
      %c0_218 = arith.constant 0 : index
      %c0_219 = arith.constant 0 : index
      %536 = vector.load %arg12[%c0_217, %c0_218, %c0_219] : memref<1x4x256xf32, #tpu.memory_space<vmem>>, vector<1x4x256xf32>
      %537 = vector.shape_cast %536 : vector<1x4x256xf32> to vector<4x256xf32>
      %538 = vector.shape_cast %535 : vector<4x256xf32> to vector<1x4x256xf32>
      tpu.vector_store %arg12[%c0_217, %c0_218, %c0_219], %538 {strides = array<i32>} : memref<1x4x256xf32, #tpu.memory_space<vmem>>, vector<1x4x256xf32>,
    } else {
    }
    %3 = arith.index_cast %arg2 : i32 to index
    %4 = memref.load %arg3[%3] : memref<4xf32, #tpu.memory_space<smem>>
    %5 = arith.index_cast %arg2 : i32 to index
    %6 = memref.load %arg4[%5] : memref<4xf32, #tpu.memory_space<smem>>
    %c0 = arith.constant 0 : index
    %7 = memref.load %arg6[%c0] : memref<1xf32, #tpu.memory_space<smem>>
    %8 = arith.mulf %4, %7 : f32
    %c0_1 = arith.constant 0 : index
    %c0_2 = arith.constant 0 : index
    %9 = vector.load %arg8[%c0_1, %c0_2] : memref<32x4xf32, #tpu.memory_space<vmem>>, vector<32x4xf32>
    %c0_3 = arith.constant 0 : index
    %c0_4 = arith.constant 0 : index
    %10 = vector.load %arg9[%c0_3, %c0_4] : memref<4x32xf32, #tpu.memory_space<vmem>>, vector<4x32xf32>
    %11 = arith.index_cast %arg2 : i32 to index
    %c0_5 = arith.constant 0 : index
    %c0_6 = arith.constant 0 : index
    %12 = vector.load %arg10[%11, %c0_5, %c0_6] : memref<4x32x1xf32, #tpu.memory_space<vmem>>, vector<1x32x1xf32>
    %13 = vector.shape_cast %12 : vector<1x32x1xf32> to vector<32x1xf32>
    %14 = vector.shape_cast %13 : vector<32x1xf32> to vector<32x1xf32>
    %15 = vector.broadcast %14 : vector<32x1xf32> to vector<32x256xf32>
    %c0_7 = arith.constant 0 : index
    %c0_8 = arith.constant 0 : index
    %16 = vector.load %arg11[%c0_7, %c0_8] : memref<4x1xf32, #tpu.memory_space<vmem>>, vector<4x1xf32>
    %17 = vector.shape_cast %16 : vector<4x1xf32> to vector<4x1xf32>
    %18 = vector.broadcast %17 : vector<4x1xf32> to vector<4x256xf32>
    %19 = vector.broadcast %6 : f32 to vector<4x256xf32>
    %20 = vector.broadcast %8 : f32 to vector<4x256xf32>
    %c0_9 = arith.constant 0 : index
    %21 = memref.load %arg5[%c0_9] : memref<1xi32, #tpu.memory_space<smem>>
    %c1663821227_i32 = arith.constant 1663821227 : i32
    %22 = arith.muli %arg0, %c1663821227_i32 : i32
    %c2135587861_i32 = arith.constant 2135587861 : i32
    %23 = arith.addi %22, %c2135587861_i32 : i32
    %24 = arith.xori %21, %23 : i32
    %c16_i32 = arith.constant 16 : i32
    %25 = arith.shrsi %24, %c16_i32 : i32
    %c65535_i32 = arith.constant 65535 : i32
    %26 = arith.andi %25, %c65535_i32 : i32
    %27 = arith.xori %24, %26 : i32
    %c73244475_i32 = arith.constant 73244475 : i32
    %28 = arith.muli %27, %c73244475_i32 : i32
    %c16_i32_10 = arith.constant 16 : i32
    %29 = arith.shrsi %28, %c16_i32_10 : i32
    %c65535_i32_11 = arith.constant 65535 : i32
    %30 = arith.andi %29, %c65535_i32_11 : i32
    %31 = arith.xori %28, %30 : i32
    %c73244475_i32_12 = arith.constant 73244475 : i32
    %32 = arith.muli %31, %c73244475_i32_12 : i32
    %c16_i32_13 = arith.constant 16 : i32
    %33 = arith.shrsi %32, %c16_i32_13 : i32
    %c65535_i32_14 = arith.constant 65535 : i32
    %34 = arith.andi %33, %c65535_i32_14 : i32
    %35 = arith.xori %32, %34 : i32
    %c1663821227_i32_15 = arith.constant 1663821227 : i32
    %36 = arith.muli %arg1, %c1663821227_i32_15 : i32
    %c2135587861_i32_16 = arith.constant 2135587861 : i32
    %37 = arith.addi %36, %c2135587861_i32_16 : i32
    %38 = arith.xori %35, %37 : i32
    %c16_i32_17 = arith.constant 16 : i32
    %39 = arith.shrsi %38, %c16_i32_17 : i32
    %c65535_i32_18 = arith.constant 65535 : i32
    %40 = arith.andi %39, %c65535_i32_18 : i32
    %41 = arith.xori %38, %40 : i32
    %c73244475_i32_19 = arith.constant 73244475 : i32
    %42 = arith.muli %41, %c73244475_i32_19 : i32
    %c16_i32_20 = arith.constant 16 : i32
    %43 = arith.shrsi %42, %c16_i32_20 : i32
    %c65535_i32_21 = arith.constant 65535 : i32
    %44 = arith.andi %43, %c65535_i32_21 : i32
    %45 = arith.xori %42, %44 : i32
    %c73244475_i32_22 = arith.constant 73244475 : i32
    %46 = arith.muli %45, %c73244475_i32_22 : i32
    %c16_i32_23 = arith.constant 16 : i32
    %47 = arith.shrsi %46, %c16_i32_23 : i32
    %c65535_i32_24 = arith.constant 65535 : i32
    %48 = arith.andi %47, %c65535_i32_24 : i32
    %49 = arith.xori %46, %48 : i32
    %c1663821227_i32_25 = arith.constant 1663821227 : i32
    %50 = arith.muli %arg2, %c1663821227_i32_25 : i32
    %c2135587861_i32_26 = arith.constant 2135587861 : i32
    %51 = arith.addi %50, %c2135587861_i32_26 : i32
    %52 = arith.xori %49, %51 : i32
    %c16_i32_27 = arith.constant 16 : i32
    %53 = arith.shrsi %52, %c16_i32_27 : i32
    %c65535_i32_28 = arith.constant 65535 : i32
    %54 = arith.andi %53, %c65535_i32_28 : i32
    %55 = arith.xori %52, %54 : i32
    %c73244475_i32_29 = arith.constant 73244475 : i32
    %56 = arith.muli %55, %c73244475_i32_29 : i32
    %c16_i32_30 = arith.constant 16 : i32
    %57 = arith.shrsi %56, %c16_i32_30 : i32
    %c65535_i32_31 = arith.constant 65535 : i32
    %58 = arith.andi %57, %c65535_i32_31 : i32
    %59 = arith.xori %56, %58 : i32
    %c73244475_i32_32 = arith.constant 73244475 : i32
    %60 = arith.muli %59, %c73244475_i32_32 : i32
    %c16_i32_33 = arith.constant 16 : i32
    %61 = arith.shrsi %60, %c16_i32_33 : i32
    %c65535_i32_34 = arith.constant 65535 : i32
    %62 = arith.andi %61, %c65535_i32_34 : i32
    %63 = arith.xori %60, %62 : i32
    %64 = tpu.iota {dimensions = array<i32: 0>} : vector<4x256xi32>
    %65 = tpu.iota {dimensions = array<i32: 1>} : vector<4x256xi32>
    %c256_i32 = arith.constant 256 : i32
    %66 = vector.broadcast %c256_i32 : i32 to vector<4x256xi32>
    %67 = arith.muli %64, %66 : vector<4x256xi32>
    %68 = arith.addi %67, %65 : vector<4x256xi32>
    %c16_i32_35 = arith.constant 16 : i32
    %69 = vector.broadcast %c16_i32_35 : i32 to vector<4x256xi32>
    %70 = arith.shrsi %68, %69 : vector<4x256xi32>
    %c65535_i32_36 = arith.constant 65535 : i32
    %71 = vector.broadcast %c65535_i32_36 : i32 to vector<4x256xi32>
    %72 = arith.andi %70, %71 : vector<4x256xi32>
    %73 = arith.xori %68, %72 : vector<4x256xi32>
    %c73244475_i32_37 = arith.constant 73244475 : i32
    %74 = vector.broadcast %c73244475_i32_37 : i32 to vector<4x256xi32>
    %75 = arith.muli %73, %74 : vector<4x256xi32>
    %c16_i32_38 = arith.constant 16 : i32
    %76 = vector.broadcast %c16_i32_38 : i32 to vector<4x256xi32>
    %77 = arith.shrsi %75, %76 : vector<4x256xi32>
    %c65535_i32_39 = arith.constant 65535 : i32
    %78 = vector.broadcast %c65535_i32_39 : i32 to vector<4x256xi32>
    %79 = arith.andi %77, %78 : vector<4x256xi32>
    %80 = arith.xori %75, %79 : vector<4x256xi32>
    %c73244475_i32_40 = arith.constant 73244475 : i32
    %81 = vector.broadcast %c73244475_i32_40 : i32 to vector<4x256xi32>
    %82 = arith.muli %80, %81 : vector<4x256xi32>
    %c16_i32_41 = arith.constant 16 : i32
    %83 = vector.broadcast %c16_i32_41 : i32 to vector<4x256xi32>
    %84 = arith.shrsi %82, %83 : vector<4x256xi32>
    %c65535_i32_42 = arith.constant 65535 : i32
    %85 = vector.broadcast %c65535_i32_42 : i32 to vector<4x256xi32>
    %86 = arith.andi %84, %85 : vector<4x256xi32>
    %87 = arith.xori %82, %86 : vector<4x256xi32>
    %c0_43 = arith.constant 0 : index
    %c0_44 = arith.constant 0 : index
    %c0_45 = arith.constant 0 : index
    %88 = vector.load %arg12[%c0_43, %c0_44, %c0_45] : memref<1x4x256xf32, #tpu.memory_space<vmem>>, vector<1x4x256xf32>
    %89 = vector.shape_cast %88 : vector<1x4x256xf32> to vector<4x256xf32>
    %c0_i32_46 = arith.constant 0 : i32
    %cst = arith.constant dense<0.000000e+00> : vector<32x256xf32>
    %90 = tpu.matmul %9, %89, %cst {dimension_numbers = #tpu.dot_dimension_numbers<[1], [0], [0], [1], [0, 0, 1, 1], [], []>} : vector<32x4xf32>, vector<4x256xf32>, vector<32x256xf32> -> vector<32x256xf32>
    %91 = arith.addf %90, %15 : vector<32x256xf32>
    %92 = arith.mulf %91, %91 : vector<32x256xf32>
    %93 = arith.mulf %91, %92 : vector<32x256xf32>
    %cst_47 = arith.constant 4.471500e-02 : f32
    %94 = vector.broadcast %cst_47 : f32 to vector<32x256xf32>
    %95 = arith.mulf %94, %93 : vector<32x256xf32>
    %96 = arith.addf %91, %95 : vector<32x256xf32>
    %cst_48 = arith.constant 0.797884583 : f32
    %97 = vector.broadcast %cst_48 : f32 to vector<32x256xf32>
    %98 = arith.mulf %97, %96 : vector<32x256xf32>
    %99 = math.tanh %98 : vector<32x256xf32>
    %cst_49 = arith.constant 1.000000e+00 : f32
    %100 = vector.broadcast %cst_49 : f32 to vector<32x256xf32>
    %101 = arith.addf %100, %99 : vector<32x256xf32>
    %cst_50 = arith.constant 5.000000e-01 : f32
    %102 = vector.broadcast %cst_50 : f32 to vector<32x256xf32>
    %103 = arith.mulf %102, %101 : vector<32x256xf32>
    %104 = arith.mulf %91, %103 : vector<32x256xf32>
    %cst_51 = arith.constant dense<0.000000e+00> : vector<4x256xf32>
    %105 = tpu.matmul %10, %104, %cst_51 {dimension_numbers = #tpu.dot_dimension_numbers<[1], [0], [0], [1], [0, 0, 1, 1], [], []>} : vector<4x32xf32>, vector<32x256xf32>, vector<4x256xf32> -> vector<4x256xf32>
    %106 = arith.addf %105, %18 : vector<4x256xf32>
    %c1374868397_i32 = arith.constant 1374868397 : i32
    %107 = arith.muli %c0_i32_46, %c1374868397_i32 : i32
    %108 = arith.addi %63, %107 : i32
    %c16_i32_52 = arith.constant 16 : i32
    %109 = arith.shrsi %108, %c16_i32_52 : i32
    %c65535_i32_53 = arith.constant 65535 : i32
    %110 = arith.andi %109, %c65535_i32_53 : i32
    %111 = arith.xori %108, %110 : i32
    %c73244475_i32_54 = arith.constant 73244475 : i32
    %112 = arith.muli %111, %c73244475_i32_54 : i32
    %c16_i32_55 = arith.constant 16 : i32
    %113 = arith.shrsi %112, %c16_i32_55 : i32
    %c65535_i32_56 = arith.constant 65535 : i32
    %114 = arith.andi %113, %c65535_i32_56 : i32
    %115 = arith.xori %112, %114 : i32
    %c73244475_i32_57 = arith.constant 73244475 : i32
    %116 = arith.muli %115, %c73244475_i32_57 : i32
    %c16_i32_58 = arith.constant 16 : i32
    %117 = arith.shrsi %116, %c16_i32_58 : i32
    %c65535_i32_59 = arith.constant 65535 : i32
    %118 = arith.andi %117, %c65535_i32_59 : i32
    %119 = arith.xori %116, %118 : i32
    %120 = vector.broadcast %119 : i32 to vector<4x256xi32>
    %121 = arith.xori %87, %120 : vector<4x256xi32>
    %c16_i32_60 = arith.constant 16 : i32
    %122 = vector.broadcast %c16_i32_60 : i32 to vector<4x256xi32>
    %123 = arith.shrsi %121, %122 : vector<4x256xi32>
    %c65535_i32_61 = arith.constant 65535 : i32
    %124 = vector.broadcast %c65535_i32_61 : i32 to vector<4x256xi32>
    %125 = arith.andi %123, %124 : vector<4x256xi32>
    %126 = arith.xori %121, %125 : vector<4x256xi32>
    %c73244475_i32_62 = arith.constant 73244475 : i32
    %127 = vector.broadcast %c73244475_i32_62 : i32 to vector<4x256xi32>
    %128 = arith.muli %126, %127 : vector<4x256xi32>
    %c16_i32_63 = arith.constant 16 : i32
    %129 = vector.broadcast %c16_i32_63 : i32 to vector<4x256xi32>
    %130 = arith.shrsi %128, %129 : vector<4x256xi32>
    %c65535_i32_64 = arith.constant 65535 : i32
    %131 = vector.broadcast %c65535_i32_64 : i32 to vector<4x256xi32>
    %132 = arith.andi %130, %131 : vector<4x256xi32>
    %133 = arith.xori %128, %132 : vector<4x256xi32>
    %c73244475_i32_65 = arith.constant 73244475 : i32
    %134 = vector.broadcast %c73244475_i32_65 : i32 to vector<4x256xi32>
    %135 = arith.muli %133, %134 : vector<4x256xi32>
    %c16_i32_66 = arith.constant 16 : i32
    %136 = vector.broadcast %c16_i32_66 : i32 to vector<4x256xi32>
    %137 = arith.shrsi %135, %136 : vector<4x256xi32>
    %c65535_i32_67 = arith.constant 65535 : i32
    %138 = vector.broadcast %c65535_i32_67 : i32 to vector<4x256xi32>
    %139 = arith.andi %137, %138 : vector<4x256xi32>
    %140 = arith.xori %135, %139 : vector<4x256xi32>
    %c2147483647_i32 = arith.constant 2147483647 : i32
    %141 = vector.broadcast %c2147483647_i32 : i32 to vector<4x256xi32>
    %142 = arith.andi %140, %141 : vector<4x256xi32>
    %c8_i32 = arith.constant 8 : i32
    %143 = vector.broadcast %c8_i32 : i32 to vector<4x256xi32>
    %144 = arith.shrsi %142, %143 : vector<4x256xi32>
    %145 = arith.sitofp %144 : vector<4x256xi32> to vector<4x256xf32>
    %cst_68 = arith.constant 5.000000e-01 : f32
    %146 = vector.broadcast %cst_68 : f32 to vector<4x256xf32>
    %147 = arith.addf %145, %146 : vector<4x256xf32>
    %cst_69 = arith.constant 1.1920929E-7 : f32
    %148 = vector.broadcast %cst_69 : f32 to vector<4x256xf32>
    %149 = arith.mulf %147, %148 : vector<4x256xf32>
    %cst_70 = arith.constant 5.000000e-01 : f32
    %150 = vector.broadcast %cst_70 : f32 to vector<4x256xf32>
    %151 = arith.subf %149, %150 : vector<4x256xf32>
    %152 = arith.mulf %151, %151 : vector<4x256xf32>
    %cst_71 = arith.constant -39.6968307 : f32
    %153 = vector.broadcast %cst_71 : f32 to vector<4x256xf32>
    %154 = arith.mulf %153, %152 : vector<4x256xf32>
    %cst_72 = arith.constant 220.946106 : f32
    %155 = vector.broadcast %cst_72 : f32 to vector<4x256xf32>
    %156 = arith.addf %154, %155 : vector<4x256xf32>
    %157 = arith.mulf %156, %152 : vector<4x256xf32>
    %cst_73 = arith.constant -275.928497 : f32
    %158 = vector.broadcast %cst_73 : f32 to vector<4x256xf32>
    %159 = arith.addf %157, %158 : vector<4x256xf32>
    %160 = arith.mulf %159, %152 : vector<4x256xf32>
    %cst_74 = arith.constant 138.357758 : f32
    %161 = vector.broadcast %cst_74 : f32 to vector<4x256xf32>
    %162 = arith.addf %160, %161 : vector<4x256xf32>
    %163 = arith.mulf %162, %152 : vector<4x256xf32>
    %cst_75 = arith.constant -30.6647987 : f32
    %164 = vector.broadcast %cst_75 : f32 to vector<4x256xf32>
    %165 = arith.addf %163, %164 : vector<4x256xf32>
    %166 = arith.mulf %165, %152 : vector<4x256xf32>
    %cst_76 = arith.constant 2.50662827 : f32
    %167 = vector.broadcast %cst_76 : f32 to vector<4x256xf32>
    %168 = arith.addf %166, %167 : vector<4x256xf32>
    %169 = arith.mulf %168, %151 : vector<4x256xf32>
    %cst_77 = arith.constant -54.4760971 : f32
    %170 = vector.broadcast %cst_77 : f32 to vector<4x256xf32>
    %171 = arith.mulf %170, %152 : vector<4x256xf32>
    %cst_78 = arith.constant 161.585831 : f32
    %172 = vector.broadcast %cst_78 : f32 to vector<4x256xf32>
    %173 = arith.addf %171, %172 : vector<4x256xf32>
    %174 = arith.mulf %173, %152 : vector<4x256xf32>
    %cst_79 = arith.constant -155.698975 : f32
    %175 = vector.broadcast %cst_79 : f32 to vector<4x256xf32>
    %176 = arith.addf %174, %175 : vector<4x256xf32>
    %177 = arith.mulf %176, %152 : vector<4x256xf32>
    %cst_80 = arith.constant 66.8013153 : f32
    %178 = vector.broadcast %cst_80 : f32 to vector<4x256xf32>
    %179 = arith.addf %177, %178 : vector<4x256xf32>
    %180 = arith.mulf %179, %152 : vector<4x256xf32>
    %cst_81 = arith.constant -13.2806816 : f32
    %181 = vector.broadcast %cst_81 : f32 to vector<4x256xf32>
    %182 = arith.addf %180, %181 : vector<4x256xf32>
    %183 = arith.mulf %182, %152 : vector<4x256xf32>
    %cst_82 = arith.constant 1.000000e+00 : f32
    %184 = vector.broadcast %cst_82 : f32 to vector<4x256xf32>
    %185 = arith.addf %183, %184 : vector<4x256xf32>
    %186 = arith.divf %169, %185 : vector<4x256xf32>
    %cst_83 = arith.constant 1.000000e+00 : f32
    %187 = vector.broadcast %cst_83 : f32 to vector<4x256xf32>
    %188 = arith.subf %187, %149 : vector<4x256xf32>
    %189 = arith.minimumf %149, %188 : vector<4x256xf32>
    %190 = math.log %189 : vector<4x256xf32>
    %cst_84 = arith.constant -2.000000e+00 : f32
    %191 = vector.broadcast %cst_84 : f32 to vector<4x256xf32>
    %192 = arith.mulf %191, %190 : vector<4x256xf32>
    %193 = math.sqrt %192 : vector<4x256xf32>
    %cst_85 = arith.constant -0.0077848942 : f32
    %194 = vector.broadcast %cst_85 : f32 to vector<4x256xf32>
    %195 = arith.mulf %194, %193 : vector<4x256xf32>
    %cst_86 = arith.constant -0.322396457 : f32
    %196 = vector.broadcast %cst_86 : f32 to vector<4x256xf32>
    %197 = arith.addf %195, %196 : vector<4x256xf32>
    %198 = arith.mulf %197, %193 : vector<4x256xf32>
    %cst_87 = arith.constant -2.40075827 : f32
    %199 = vector.broadcast %cst_87 : f32 to vector<4x256xf32>
    %200 = arith.addf %198, %199 : vector<4x256xf32>
    %201 = arith.mulf %200, %193 : vector<4x256xf32>
    %cst_88 = arith.constant -2.54973245 : f32
    %202 = vector.broadcast %cst_88 : f32 to vector<4x256xf32>
    %203 = arith.addf %201, %202 : vector<4x256xf32>
    %204 = arith.mulf %203, %193 : vector<4x256xf32>
    %cst_89 = arith.constant 4.37466431 : f32
    %205 = vector.broadcast %cst_89 : f32 to vector<4x256xf32>
    %206 = arith.addf %204, %205 : vector<4x256xf32>
    %207 = arith.mulf %206, %193 : vector<4x256xf32>
    %cst_90 = arith.constant 2.938164 : f32
    %208 = vector.broadcast %cst_90 : f32 to vector<4x256xf32>
    %209 = arith.addf %207, %208 : vector<4x256xf32>
    %cst_91 = arith.constant 0.00778469583 : f32
    %210 = vector.broadcast %cst_91 : f32 to vector<4x256xf32>
    %211 = arith.mulf %210, %193 : vector<4x256xf32>
    %cst_92 = arith.constant 0.322467119 : f32
    %212 = vector.broadcast %cst_92 : f32 to vector<4x256xf32>
    %213 = arith.addf %211, %212 : vector<4x256xf32>
    %214 = arith.mulf %213, %193 : vector<4x256xf32>
    %cst_93 = arith.constant 2.44513416 : f32
    %215 = vector.broadcast %cst_93 : f32 to vector<4x256xf32>
    %216 = arith.addf %214, %215 : vector<4x256xf32>
    %217 = arith.mulf %216, %193 : vector<4x256xf32>
    %cst_94 = arith.constant 3.7544086 : f32
    %218 = vector.broadcast %cst_94 : f32 to vector<4x256xf32>
    %219 = arith.addf %217, %218 : vector<4x256xf32>
    %220 = arith.mulf %219, %193 : vector<4x256xf32>
    %cst_95 = arith.constant 1.000000e+00 : f32
    %221 = vector.broadcast %cst_95 : f32 to vector<4x256xf32>
    %222 = arith.addf %220, %221 : vector<4x256xf32>
    %223 = arith.divf %209, %222 : vector<4x256xf32>
    %cst_96 = arith.constant 5.000000e-01 : f32
    %224 = vector.broadcast %cst_96 : f32 to vector<4x256xf32>
    %225 = arith.cmpf olt, %149, %224 : vector<4x256xf32>
    %cst_97 = arith.constant 0.000000e+00 : f32
    %226 = vector.broadcast %cst_97 : f32 to vector<4x256xf32>
    %227 = arith.subf %226, %223 : vector<4x256xf32>
    %228 = arith.select %225, %223, %227 : vector<4x256xi1>, vector<4x256xf32>
    %229 = math.absf %151 : vector<4x256xf32>
    %cst_98 = arith.constant 4.757500e-01 : f32
    %230 = vector.broadcast %cst_98 : f32 to vector<4x256xf32>
    %231 = arith.cmpf ole, %229, %230 : vector<4x256xf32>
    %232 = arith.select %231, %186, %228 : vector<4x256xi1>, vector<4x256xf32>
    %233 = arith.mulf %19, %106 : vector<4x256xf32>
    %234 = arith.addf %89, %233 : vector<4x256xf32>
    %235 = arith.mulf %20, %232 : vector<4x256xf32>
    %236 = arith.addf %234, %235 : vector<4x256xf32>
    %c1_i32 = arith.constant 1 : i32
    %cst_99 = arith.constant dense<0.000000e+00> : vector<32x256xf32>
    %237 = tpu.matmul %9, %236, %cst_99 {dimension_numbers = #tpu.dot_dimension_numbers<[1], [0], [0], [1], [0, 0, 1, 1], [], []>} : vector<32x4xf32>, vector<4x256xf32>, vector<32x256xf32> -> vector<32x256xf32>
    %238 = arith.addf %237, %15 : vector<32x256xf32>
    %239 = arith.mulf %238, %238 : vector<32x256xf32>
    %240 = arith.mulf %238, %239 : vector<32x256xf32>
    %cst_100 = arith.constant 4.471500e-02 : f32
    %241 = vector.broadcast %cst_100 : f32 to vector<32x256xf32>
    %242 = arith.mulf %241, %240 : vector<32x256xf32>
    %243 = arith.addf %238, %242 : vector<32x256xf32>
    %cst_101 = arith.constant 0.797884583 : f32
    %244 = vector.broadcast %cst_101 : f32 to vector<32x256xf32>
    %245 = arith.mulf %244, %243 : vector<32x256xf32>
    %246 = math.tanh %245 : vector<32x256xf32>
    %cst_102 = arith.constant 1.000000e+00 : f32
    %247 = vector.broadcast %cst_102 : f32 to vector<32x256xf32>
    %248 = arith.addf %247, %246 : vector<32x256xf32>
    %cst_103 = arith.constant 5.000000e-01 : f32
    %249 = vector.broadcast %cst_103 : f32 to vector<32x256xf32>
    %250 = arith.mulf %249, %248 : vector<32x256xf32>
    %251 = arith.mulf %238, %250 : vector<32x256xf32>
    %cst_104 = arith.constant dense<0.000000e+00> : vector<4x256xf32>
    %252 = tpu.matmul %10, %251, %cst_104 {dimension_numbers = #tpu.dot_dimension_numbers<[1], [0], [0], [1], [0, 0, 1, 1], [], []>} : vector<4x32xf32>, vector<32x256xf32>, vector<4x256xf32> -> vector<4x256xf32>
    %253 = arith.addf %252, %18 : vector<4x256xf32>
    %c1374868397_i32_105 = arith.constant 1374868397 : i32
    %254 = arith.muli %c1_i32, %c1374868397_i32_105 : i32
    %255 = arith.addi %63, %254 : i32
    %c16_i32_106 = arith.constant 16 : i32
    %256 = arith.shrsi %255, %c16_i32_106 : i32
    %c65535_i32_107 = arith.constant 65535 : i32
    %257 = arith.andi %256, %c65535_i32_107 : i32
    %258 = arith.xori %255, %257 : i32
    %c73244475_i32_108 = arith.constant 73244475 : i32
    %259 = arith.muli %258, %c73244475_i32_108 : i32
    %c16_i32_109 = arith.constant 16 : i32
    %260 = arith.shrsi %259, %c16_i32_109 : i32
    %c65535_i32_110 = arith.constant 65535 : i32
    %261 = arith.andi %260, %c65535_i32_110 : i32
    %262 = arith.xori %259, %261 : i32
    %c73244475_i32_111 = arith.constant 73244475 : i32
    %263 = arith.muli %262, %c73244475_i32_111 : i32
    %c16_i32_112 = arith.constant 16 : i32
    %264 = arith.shrsi %263, %c16_i32_112 : i32
    %c65535_i32_113 = arith.constant 65535 : i32
    %265 = arith.andi %264, %c65535_i32_113 : i32
    %266 = arith.xori %263, %265 : i32
    %267 = vector.broadcast %266 : i32 to vector<4x256xi32>
    %268 = arith.xori %87, %267 : vector<4x256xi32>
    %c16_i32_114 = arith.constant 16 : i32
    %269 = vector.broadcast %c16_i32_114 : i32 to vector<4x256xi32>
    %270 = arith.shrsi %268, %269 : vector<4x256xi32>
    %c65535_i32_115 = arith.constant 65535 : i32
    %271 = vector.broadcast %c65535_i32_115 : i32 to vector<4x256xi32>
    %272 = arith.andi %270, %271 : vector<4x256xi32>
    %273 = arith.xori %268, %272 : vector<4x256xi32>
    %c73244475_i32_116 = arith.constant 73244475 : i32
    %274 = vector.broadcast %c73244475_i32_116 : i32 to vector<4x256xi32>
    %275 = arith.muli %273, %274 : vector<4x256xi32>
    %c16_i32_117 = arith.constant 16 : i32
    %276 = vector.broadcast %c16_i32_117 : i32 to vector<4x256xi32>
    %277 = arith.shrsi %275, %276 : vector<4x256xi32>
    %c65535_i32_118 = arith.constant 65535 : i32
    %278 = vector.broadcast %c65535_i32_118 : i32 to vector<4x256xi32>
    %279 = arith.andi %277, %278 : vector<4x256xi32>
    %280 = arith.xori %275, %279 : vector<4x256xi32>
    %c73244475_i32_119 = arith.constant 73244475 : i32
    %281 = vector.broadcast %c73244475_i32_119 : i32 to vector<4x256xi32>
    %282 = arith.muli %280, %281 : vector<4x256xi32>
    %c16_i32_120 = arith.constant 16 : i32
    %283 = vector.broadcast %c16_i32_120 : i32 to vector<4x256xi32>
    %284 = arith.shrsi %282, %283 : vector<4x256xi32>
    %c65535_i32_121 = arith.constant 65535 : i32
    %285 = vector.broadcast %c65535_i32_121 : i32 to vector<4x256xi32>
    %286 = arith.andi %284, %285 : vector<4x256xi32>
    %287 = arith.xori %282, %286 : vector<4x256xi32>
    %c2147483647_i32_122 = arith.constant 2147483647 : i32
    %288 = vector.broadcast %c2147483647_i32_122 : i32 to vector<4x256xi32>
    %289 = arith.andi %287, %288 : vector<4x256xi32>
    %c8_i32_123 = arith.constant 8 : i32
    %290 = vector.broadcast %c8_i32_123 : i32 to vector<4x256xi32>
    %291 = arith.shrsi %289, %290 : vector<4x256xi32>
    %292 = arith.sitofp %291 : vector<4x256xi32> to vector<4x256xf32>
    %cst_124 = arith.constant 5.000000e-01 : f32
    %293 = vector.broadcast %cst_124 : f32 to vector<4x256xf32>
    %294 = arith.addf %292, %293 : vector<4x256xf32>
    %cst_125 = arith.constant 1.1920929E-7 : f32
    %295 = vector.broadcast %cst_125 : f32 to vector<4x256xf32>
    %296 = arith.mulf %294, %295 : vector<4x256xf32>
    %cst_126 = arith.constant 5.000000e-01 : f32
    %297 = vector.broadcast %cst_126 : f32 to vector<4x256xf32>
    %298 = arith.subf %296, %297 : vector<4x256xf32>
    %299 = arith.mulf %298, %298 : vector<4x256xf32>
    %cst_127 = arith.constant -39.6968307 : f32
    %300 = vector.broadcast %cst_127 : f32 to vector<4x256xf32>
    %301 = arith.mulf %300, %299 : vector<4x256xf32>
    %cst_128 = arith.constant 220.946106 : f32
    %302 = vector.broadcast %cst_128 : f32 to vector<4x256xf32>
    %303 = arith.addf %301, %302 : vector<4x256xf32>
    %304 = arith.mulf %303, %299 : vector<4x256xf32>
    %cst_129 = arith.constant -275.928497 : f32
    %305 = vector.broadcast %cst_129 : f32 to vector<4x256xf32>
    %306 = arith.addf %304, %305 : vector<4x256xf32>
    %307 = arith.mulf %306, %299 : vector<4x256xf32>
    %cst_130 = arith.constant 138.357758 : f32
    %308 = vector.broadcast %cst_130 : f32 to vector<4x256xf32>
    %309 = arith.addf %307, %308 : vector<4x256xf32>
    %310 = arith.mulf %309, %299 : vector<4x256xf32>
    %cst_131 = arith.constant -30.6647987 : f32
    %311 = vector.broadcast %cst_131 : f32 to vector<4x256xf32>
    %312 = arith.addf %310, %311 : vector<4x256xf32>
    %313 = arith.mulf %312, %299 : vector<4x256xf32>
    %cst_132 = arith.constant 2.50662827 : f32
    %314 = vector.broadcast %cst_132 : f32 to vector<4x256xf32>
    %315 = arith.addf %313, %314 : vector<4x256xf32>
    %316 = arith.mulf %315, %298 : vector<4x256xf32>
    %cst_133 = arith.constant -54.4760971 : f32
    %317 = vector.broadcast %cst_133 : f32 to vector<4x256xf32>
    %318 = arith.mulf %317, %299 : vector<4x256xf32>
    %cst_134 = arith.constant 161.585831 : f32
    %319 = vector.broadcast %cst_134 : f32 to vector<4x256xf32>
    %320 = arith.addf %318, %319 : vector<4x256xf32>
    %321 = arith.mulf %320, %299 : vector<4x256xf32>
    %cst_135 = arith.constant -155.698975 : f32
    %322 = vector.broadcast %cst_135 : f32 to vector<4x256xf32>
    %323 = arith.addf %321, %322 : vector<4x256xf32>
    %324 = arith.mulf %323, %299 : vector<4x256xf32>
    %cst_136 = arith.constant 66.8013153 : f32
    %325 = vector.broadcast %cst_136 : f32 to vector<4x256xf32>
    %326 = arith.addf %324, %325 : vector<4x256xf32>
    %327 = arith.mulf %326, %299 : vector<4x256xf32>
    %cst_137 = arith.constant -13.2806816 : f32
    %328 = vector.broadcast %cst_137 : f32 to vector<4x256xf32>
    %329 = arith.addf %327, %328 : vector<4x256xf32>
    %330 = arith.mulf %329, %299 : vector<4x256xf32>
    %cst_138 = arith.constant 1.000000e+00 : f32
    %331 = vector.broadcast %cst_138 : f32 to vector<4x256xf32>
    %332 = arith.addf %330, %331 : vector<4x256xf32>
    %333 = arith.divf %316, %332 : vector<4x256xf32>
    %cst_139 = arith.constant 1.000000e+00 : f32
    %334 = vector.broadcast %cst_139 : f32 to vector<4x256xf32>
    %335 = arith.subf %334, %296 : vector<4x256xf32>
    %336 = arith.minimumf %296, %335 : vector<4x256xf32>
    %337 = math.log %336 : vector<4x256xf32>
    %cst_140 = arith.constant -2.000000e+00 : f32
    %338 = vector.broadcast %cst_140 : f32 to vector<4x256xf32>
    %339 = arith.mulf %338, %337 : vector<4x256xf32>
    %340 = math.sqrt %339 : vector<4x256xf32>
    %cst_141 = arith.constant -0.0077848942 : f32
    %341 = vector.broadcast %cst_141 : f32 to vector<4x256xf32>
    %342 = arith.mulf %341, %340 : vector<4x256xf32>
    %cst_142 = arith.constant -0.322396457 : f32
    %343 = vector.broadcast %cst_142 : f32 to vector<4x256xf32>
    %344 = arith.addf %342, %343 : vector<4x256xf32>
    %345 = arith.mulf %344, %340 : vector<4x256xf32>
    %cst_143 = arith.constant -2.40075827 : f32
    %346 = vector.broadcast %cst_143 : f32 to vector<4x256xf32>
    %347 = arith.addf %345, %346 : vector<4x256xf32>
    %348 = arith.mulf %347, %340 : vector<4x256xf32>
    %cst_144 = arith.constant -2.54973245 : f32
    %349 = vector.broadcast %cst_144 : f32 to vector<4x256xf32>
    %350 = arith.addf %348, %349 : vector<4x256xf32>
    %351 = arith.mulf %350, %340 : vector<4x256xf32>
    %cst_145 = arith.constant 4.37466431 : f32
    %352 = vector.broadcast %cst_145 : f32 to vector<4x256xf32>
    %353 = arith.addf %351, %352 : vector<4x256xf32>
    %354 = arith.mulf %353, %340 : vector<4x256xf32>
    %cst_146 = arith.constant 2.938164 : f32
    %355 = vector.broadcast %cst_146 : f32 to vector<4x256xf32>
    %356 = arith.addf %354, %355 : vector<4x256xf32>
    %cst_147 = arith.constant 0.00778469583 : f32
    %357 = vector.broadcast %cst_147 : f32 to vector<4x256xf32>
    %358 = arith.mulf %357, %340 : vector<4x256xf32>
    %cst_148 = arith.constant 0.322467119 : f32
    %359 = vector.broadcast %cst_148 : f32 to vector<4x256xf32>
    %360 = arith.addf %358, %359 : vector<4x256xf32>
    %361 = arith.mulf %360, %340 : vector<4x256xf32>
    %cst_149 = arith.constant 2.44513416 : f32
    %362 = vector.broadcast %cst_149 : f32 to vector<4x256xf32>
    %363 = arith.addf %361, %362 : vector<4x256xf32>
    %364 = arith.mulf %363, %340 : vector<4x256xf32>
    %cst_150 = arith.constant 3.7544086 : f32
    %365 = vector.broadcast %cst_150 : f32 to vector<4x256xf32>
    %366 = arith.addf %364, %365 : vector<4x256xf32>
    %367 = arith.mulf %366, %340 : vector<4x256xf32>
    %cst_151 = arith.constant 1.000000e+00 : f32
    %368 = vector.broadcast %cst_151 : f32 to vector<4x256xf32>
    %369 = arith.addf %367, %368 : vector<4x256xf32>
    %370 = arith.divf %356, %369 : vector<4x256xf32>
    %cst_152 = arith.constant 5.000000e-01 : f32
    %371 = vector.broadcast %cst_152 : f32 to vector<4x256xf32>
    %372 = arith.cmpf olt, %296, %371 : vector<4x256xf32>
    %cst_153 = arith.constant 0.000000e+00 : f32
    %373 = vector.broadcast %cst_153 : f32 to vector<4x256xf32>
    %374 = arith.subf %373, %370 : vector<4x256xf32>
    %375 = arith.select %372, %370, %374 : vector<4x256xi1>, vector<4x256xf32>
    %376 = math.absf %298 : vector<4x256xf32>
    %cst_154 = arith.constant 4.757500e-01 : f32
    %377 = vector.broadcast %cst_154 : f32 to vector<4x256xf32>
    %378 = arith.cmpf ole, %376, %377 : vector<4x256xf32>
    %379 = arith.select %378, %333, %375 : vector<4x256xi1>, vector<4x256xf32>
    %380 = arith.mulf %19, %253 : vector<4x256xf32>
    %381 = arith.addf %236, %380 : vector<4x256xf32>
    %382 = arith.mulf %20, %379 : vector<4x256xf32>
    %383 = arith.addf %381, %382 : vector<4x256xf32>
    %c2_i32 = arith.constant 2 : i32
    %cst_155 = arith.constant dense<0.000000e+00> : vector<32x256xf32>
    %384 = tpu.matmul %9, %383, %cst_155 {dimension_numbers = #tpu.dot_dimension_numbers<[1], [0], [0], [1], [0, 0, 1, 1], [], []>} : vector<32x4xf32>, vector<4x256xf32>, vector<32x256xf32> -> vector<32x256xf32>
    %385 = arith.addf %384, %15 : vector<32x256xf32>
    %386 = arith.mulf %385, %385 : vector<32x256xf32>
    %387 = arith.mulf %385, %386 : vector<32x256xf32>
    %cst_156 = arith.constant 4.471500e-02 : f32
    %388 = vector.broadcast %cst_156 : f32 to vector<32x256xf32>
    %389 = arith.mulf %388, %387 : vector<32x256xf32>
    %390 = arith.addf %385, %389 : vector<32x256xf32>
    %cst_157 = arith.constant 0.797884583 : f32
    %391 = vector.broadcast %cst_157 : f32 to vector<32x256xf32>
    %392 = arith.mulf %391, %390 : vector<32x256xf32>
    %393 = math.tanh %392 : vector<32x256xf32>
    %cst_158 = arith.constant 1.000000e+00 : f32
    %394 = vector.broadcast %cst_158 : f32 to vector<32x256xf32>
    %395 = arith.addf %394, %393 : vector<32x256xf32>
    %cst_159 = arith.constant 5.000000e-01 : f32
    %396 = vector.broadcast %cst_159 : f32 to vector<32x256xf32>
    %397 = arith.mulf %396, %395 : vector<32x256xf32>
    %398 = arith.mulf %385, %397 : vector<32x256xf32>
    %cst_160 = arith.constant dense<0.000000e+00> : vector<4x256xf32>
    %399 = tpu.matmul %10, %398, %cst_160 {dimension_numbers = #tpu.dot_dimension_numbers<[1], [0], [0], [1], [0, 0, 1, 1], [], []>} : vector<4x32xf32>, vector<32x256xf32>, vector<4x256xf32> -> vector<4x256xf32>
    %400 = arith.addf %399, %18 : vector<4x256xf32>
    %c1374868397_i32_161 = arith.constant 1374868397 : i32
    %401 = arith.muli %c2_i32, %c1374868397_i32_161 : i32
    %402 = arith.addi %63, %401 : i32
    %c16_i32_162 = arith.constant 16 : i32
    %403 = arith.shrsi %402, %c16_i32_162 : i32
    %c65535_i32_163 = arith.constant 65535 : i32
    %404 = arith.andi %403, %c65535_i32_163 : i32
    %405 = arith.xori %402, %404 : i32
    %c73244475_i32_164 = arith.constant 73244475 : i32
    %406 = arith.muli %405, %c73244475_i32_164 : i32
    %c16_i32_165 = arith.constant 16 : i32
    %407 = arith.shrsi %406, %c16_i32_165 : i32
    %c65535_i32_166 = arith.constant 65535 : i32
    %408 = arith.andi %407, %c65535_i32_166 : i32
    %409 = arith.xori %406, %408 : i32
    %c73244475_i32_167 = arith.constant 73244475 : i32
    %410 = arith.muli %409, %c73244475_i32_167 : i32
    %c16_i32_168 = arith.constant 16 : i32
    %411 = arith.shrsi %410, %c16_i32_168 : i32
    %c65535_i32_169 = arith.constant 65535 : i32
    %412 = arith.andi %411, %c65535_i32_169 : i32
    %413 = arith.xori %410, %412 : i32
    %414 = vector.broadcast %413 : i32 to vector<4x256xi32>
    %415 = arith.xori %87, %414 : vector<4x256xi32>
    %c16_i32_170 = arith.constant 16 : i32
    %416 = vector.broadcast %c16_i32_170 : i32 to vector<4x256xi32>
    %417 = arith.shrsi %415, %416 : vector<4x256xi32>
    %c65535_i32_171 = arith.constant 65535 : i32
    %418 = vector.broadcast %c65535_i32_171 : i32 to vector<4x256xi32>
    %419 = arith.andi %417, %418 : vector<4x256xi32>
    %420 = arith.xori %415, %419 : vector<4x256xi32>
    %c73244475_i32_172 = arith.constant 73244475 : i32
    %421 = vector.broadcast %c73244475_i32_172 : i32 to vector<4x256xi32>
    %422 = arith.muli %420, %421 : vector<4x256xi32>
    %c16_i32_173 = arith.constant 16 : i32
    %423 = vector.broadcast %c16_i32_173 : i32 to vector<4x256xi32>
    %424 = arith.shrsi %422, %423 : vector<4x256xi32>
    %c65535_i32_174 = arith.constant 65535 : i32
    %425 = vector.broadcast %c65535_i32_174 : i32 to vector<4x256xi32>
    %426 = arith.andi %424, %425 : vector<4x256xi32>
    %427 = arith.xori %422, %426 : vector<4x256xi32>
    %c73244475_i32_175 = arith.constant 73244475 : i32
    %428 = vector.broadcast %c73244475_i32_175 : i32 to vector<4x256xi32>
    %429 = arith.muli %427, %428 : vector<4x256xi32>
    %c16_i32_176 = arith.constant 16 : i32
    %430 = vector.broadcast %c16_i32_176 : i32 to vector<4x256xi32>
    %431 = arith.shrsi %429, %430 : vector<4x256xi32>
    %c65535_i32_177 = arith.constant 65535 : i32
    %432 = vector.broadcast %c65535_i32_177 : i32 to vector<4x256xi32>
    %433 = arith.andi %431, %432 : vector<4x256xi32>
    %434 = arith.xori %429, %433 : vector<4x256xi32>
    %c2147483647_i32_178 = arith.constant 2147483647 : i32
    %435 = vector.broadcast %c2147483647_i32_178 : i32 to vector<4x256xi32>
    %436 = arith.andi %434, %435 : vector<4x256xi32>
    %c8_i32_179 = arith.constant 8 : i32
    %437 = vector.broadcast %c8_i32_179 : i32 to vector<4x256xi32>
    %438 = arith.shrsi %436, %437 : vector<4x256xi32>
    %439 = arith.sitofp %438 : vector<4x256xi32> to vector<4x256xf32>
    %cst_180 = arith.constant 5.000000e-01 : f32
    %440 = vector.broadcast %cst_180 : f32 to vector<4x256xf32>
    %441 = arith.addf %439, %440 : vector<4x256xf32>
    %cst_181 = arith.constant 1.1920929E-7 : f32
    %442 = vector.broadcast %cst_181 : f32 to vector<4x256xf32>
    %443 = arith.mulf %441, %442 : vector<4x256xf32>
    %cst_182 = arith.constant 5.000000e-01 : f32
    %444 = vector.broadcast %cst_182 : f32 to vector<4x256xf32>
    %445 = arith.subf %443, %444 : vector<4x256xf32>
    %446 = arith.mulf %445, %445 : vector<4x256xf32>
    %cst_183 = arith.constant -39.6968307 : f32
    %447 = vector.broadcast %cst_183 : f32 to vector<4x256xf32>
    %448 = arith.mulf %447, %446 : vector<4x256xf32>
    %cst_184 = arith.constant 220.946106 : f32
    %449 = vector.broadcast %cst_184 : f32 to vector<4x256xf32>
    %450 = arith.addf %448, %449 : vector<4x256xf32>
    %451 = arith.mulf %450, %446 : vector<4x256xf32>
    %cst_185 = arith.constant -275.928497 : f32
    %452 = vector.broadcast %cst_185 : f32 to vector<4x256xf32>
    %453 = arith.addf %451, %452 : vector<4x256xf32>
    %454 = arith.mulf %453, %446 : vector<4x256xf32>
    %cst_186 = arith.constant 138.357758 : f32
    %455 = vector.broadcast %cst_186 : f32 to vector<4x256xf32>
    %456 = arith.addf %454, %455 : vector<4x256xf32>
    %457 = arith.mulf %456, %446 : vector<4x256xf32>
    %cst_187 = arith.constant -30.6647987 : f32
    %458 = vector.broadcast %cst_187 : f32 to vector<4x256xf32>
    %459 = arith.addf %457, %458 : vector<4x256xf32>
    %460 = arith.mulf %459, %446 : vector<4x256xf32>
    %cst_188 = arith.constant 2.50662827 : f32
    %461 = vector.broadcast %cst_188 : f32 to vector<4x256xf32>
    %462 = arith.addf %460, %461 : vector<4x256xf32>
    %463 = arith.mulf %462, %445 : vector<4x256xf32>
    %cst_189 = arith.constant -54.4760971 : f32
    %464 = vector.broadcast %cst_189 : f32 to vector<4x256xf32>
    %465 = arith.mulf %464, %446 : vector<4x256xf32>
    %cst_190 = arith.constant 161.585831 : f32
    %466 = vector.broadcast %cst_190 : f32 to vector<4x256xf32>
    %467 = arith.addf %465, %466 : vector<4x256xf32>
    %468 = arith.mulf %467, %446 : vector<4x256xf32>
    %cst_191 = arith.constant -155.698975 : f32
    %469 = vector.broadcast %cst_191 : f32 to vector<4x256xf32>
    %470 = arith.addf %468, %469 : vector<4x256xf32>
    %471 = arith.mulf %470, %446 : vector<4x256xf32>
    %cst_192 = arith.constant 66.8013153 : f32
    %472 = vector.broadcast %cst_192 : f32 to vector<4x256xf32>
    %473 = arith.addf %471, %472 : vector<4x256xf32>
    %474 = arith.mulf %473, %446 : vector<4x256xf32>
    %cst_193 = arith.constant -13.2806816 : f32
    %475 = vector.broadcast %cst_193 : f32 to vector<4x256xf32>
    %476 = arith.addf %474, %475 : vector<4x256xf32>
    %477 = arith.mulf %476, %446 : vector<4x256xf32>
    %cst_194 = arith.constant 1.000000e+00 : f32
    %478 = vector.broadcast %cst_194 : f32 to vector<4x256xf32>
    %479 = arith.addf %477, %478 : vector<4x256xf32>
    %480 = arith.divf %463, %479 : vector<4x256xf32>
    %cst_195 = arith.constant 1.000000e+00 : f32
    %481 = vector.broadcast %cst_195 : f32 to vector<4x256xf32>
    %482 = arith.subf %481, %443 : vector<4x256xf32>
    %483 = arith.minimumf %443, %482 : vector<4x256xf32>
    %484 = math.log %483 : vector<4x256xf32>
    %cst_196 = arith.constant -2.000000e+00 : f32
    %485 = vector.broadcast %cst_196 : f32 to vector<4x256xf32>
    %486 = arith.mulf %485, %484 : vector<4x256xf32>
    %487 = math.sqrt %486 : vector<4x256xf32>
    %cst_197 = arith.constant -0.0077848942 : f32
    %488 = vector.broadcast %cst_197 : f32 to vector<4x256xf32>
    %489 = arith.mulf %488, %487 : vector<4x256xf32>
    %cst_198 = arith.constant -0.322396457 : f32
    %490 = vector.broadcast %cst_198 : f32 to vector<4x256xf32>
    %491 = arith.addf %489, %490 : vector<4x256xf32>
    %492 = arith.mulf %491, %487 : vector<4x256xf32>
    %cst_199 = arith.constant -2.40075827 : f32
    %493 = vector.broadcast %cst_199 : f32 to vector<4x256xf32>
    %494 = arith.addf %492, %493 : vector<4x256xf32>
    %495 = arith.mulf %494, %487 : vector<4x256xf32>
    %cst_200 = arith.constant -2.54973245 : f32
    %496 = vector.broadcast %cst_200 : f32 to vector<4x256xf32>
    %497 = arith.addf %495, %496 : vector<4x256xf32>
    %498 = arith.mulf %497, %487 : vector<4x256xf32>
    %cst_201 = arith.constant 4.37466431 : f32
    %499 = vector.broadcast %cst_201 : f32 to vector<4x256xf32>
    %500 = arith.addf %498, %499 : vector<4x256xf32>
    %501 = arith.mulf %500, %487 : vector<4x256xf32>
    %cst_202 = arith.constant 2.938164 : f32
    %502 = vector.broadcast %cst_202 : f32 to vector<4x256xf32>
    %503 = arith.addf %501, %502 : vector<4x256xf32>
    %cst_203 = arith.constant 0.00778469583 : f32
    %504 = vector.broadcast %cst_203 : f32 to vector<4x256xf32>
    %505 = arith.mulf %504, %487 : vector<4x256xf32>
    %cst_204 = arith.constant 0.322467119 : f32
    %506 = vector.broadcast %cst_204 : f32 to vector<4x256xf32>
    %507 = arith.addf %505, %506 : vector<4x256xf32>
    %508 = arith.mulf %507, %487 : vector<4x256xf32>
    %cst_205 = arith.constant 2.44513416 : f32
    %509 = vector.broadcast %cst_205 : f32 to vector<4x256xf32>
    %510 = arith.addf %508, %509 : vector<4x256xf32>
    %511 = arith.mulf %510, %487 : vector<4x256xf32>
    %cst_206 = arith.constant 3.7544086 : f32
    %512 = vector.broadcast %cst_206 : f32 to vector<4x256xf32>
    %513 = arith.addf %511, %512 : vector<4x256xf32>
    %514 = arith.mulf %513, %487 : vector<4x256xf32>
    %cst_207 = arith.constant 1.000000e+00 : f32
    %515 = vector.broadcast %cst_207 : f32 to vector<4x256xf32>
    %516 = arith.addf %514, %515 : vector<4x256xf32>
    %517 = arith.divf %503, %516 : vector<4x256xf32>
    %cst_208 = arith.constant 5.000000e-01 : f32
    %518 = vector.broadcast %cst_208 : f32 to vector<4x256xf32>
    %519 = arith.cmpf olt, %443, %518 : vector<4x256xf32>
    %cst_209 = arith.constant 0.000000e+00 : f32
    %520 = vector.broadcast %cst_209 : f32 to vector<4x256xf32>
    %521 = arith.subf %520, %517 : vector<4x256xf32>
    %522 = arith.select %519, %517, %521 : vector<4x256xi1>, vector<4x256xf32>
    %523 = math.absf %445 : vector<4x256xf32>
    %cst_210 = arith.constant 4.757500e-01 : f32
    %524 = vector.broadcast %cst_210 : f32 to vector<4x256xf32>
    %525 = arith.cmpf ole, %523, %524 : vector<4x256xf32>
    %526 = arith.select %525, %480, %522 : vector<4x256xi1>, vector<4x256xf32>
    %527 = arith.mulf %19, %400 : vector<4x256xf32>
    %528 = arith.addf %383, %527 : vector<4x256xf32>
    %529 = arith.mulf %20, %526 : vector<4x256xf32>
    %530 = arith.addf %528, %529 : vector<4x256xf32>
    %c3_i32 = arith.constant 3 : i32
    %c0_211 = arith.constant 0 : index
    %c0_212 = arith.constant 0 : index
    %c0_213 = arith.constant 0 : index
    %531 = vector.load %arg12[%c0_211, %c0_212, %c0_213] : memref<1x4x256xf32, #tpu.memory_space<vmem>>, vector<1x4x256xf32>
    %532 = vector.shape_cast %531 : vector<1x4x256xf32> to vector<4x256xf32>
    %533 = vector.shape_cast %530 : vector<4x256xf32> to vector<1x4x256xf32>
    tpu.vector_store %arg12[%c0_211, %c0_212, %c0_213], %533 {strides = array<i32>} : memref<1x4x256xf32, #tpu.memory_space<vmem>>, vector<1x4x256xf32>,
    return
  }
  func.func @transform_0(%arg0: i32, %arg1: i32, %arg2: i32) -> i32 {
    %c0_i32 = arith.constant 0 : i32
    %c0_i32_0 = arith.constant 0 : i32
    return %c0_i32 : i32
  }
  func.func @transform_1(%arg0: i32, %arg1: i32, %arg2: i32) -> i32 {
    %c0_i32 = arith.constant 0 : i32
    %c0_i32_0 = arith.constant 0 : i32
    return %c0_i32 : i32
  }
  func.func @transform_2(%arg0: i32, %arg1: i32, %arg2: i32) -> i32 {
    %c0_i32 = arith.constant 0 : i32
    %c0_i32_0 = arith.constant 0 : i32
    return %c0_i32 : i32
  }
  func.func @transform_3(%arg0: i32, %arg1: i32, %arg2: i32) -> i32 {
    %c0_i32 = arith.constant 0 : i32
    %c0_i32_0 = arith.constant 0 : i32
    return %c0_i32 : i32
  }
  func.func @transform_4(%arg0: i32, %arg1: i32, %arg2: i32) -> (i32, i32, i32) {
    %c0_i32 = arith.constant 0 : i32
    %c0_i32_0 = arith.constant 0 : i32
    return %arg0, %c0_i32, %arg1 : i32, i32, i32
  }
  func.func @transform_5(%arg0: i32, %arg1: i32, %arg2: i32) -> (i32, i32) {
    %c0_i32 = arith.constant 0 : i32
    %c0_i32_0 = arith.constant 0 : i32
    %c0_i32_1 = arith.constant 0 : i32
    return %c0_i32, %c0_i32_0 : i32, i32
  }
  func.func @transform_6(%arg0: i32, %arg1: i32, %arg2: i32) -> (i32, i32) {
    %c0_i32 = arith.constant 0 : i32
    %c0_i32_0 = arith.constant 0 : i32
    %c0_i32_1 = arith.constant 0 : i32
    return %c0_i32, %c0_i32_0 : i32, i32
  }
  func.func @transform_7(%arg0: i32, %arg1: i32, %arg2: i32) -> (i32, i32, i32) {
    %c0_i32 = arith.constant 0 : i32
    %c0_i32_0 = arith.constant 0 : i32
    %c0_i32_1 = arith.constant 0 : i32
    %c0_i32_2 = arith.constant 0 : i32
    return %c0_i32, %c0_i32_0, %c0_i32_1 : i32, i32, i32
  }
  func.func @transform_8(%arg0: i32, %arg1: i32, %arg2: i32) -> (i32, i32) {
    %c0_i32 = arith.constant 0 : i32
    %c0_i32_0 = arith.constant 0 : i32
    %c0_i32_1 = arith.constant 0 : i32
    return %c0_i32, %c0_i32_0 : i32, i32
  }
  func.func @transform_9(%arg0: i32, %arg1: i32, %arg2: i32) -> (i32, i32, i32) {
    %c0_i32 = arith.constant 0 : i32
    %c0_i32_0 = arith.constant 0 : i32
    return %arg0, %c0_i32, %arg1 : i32, i32, i32
  }
}

</mosaic_0001>

<bundles_post_ra>
// kernel: tpu_custom_call.1
= control target key start
LH: loop header
LB: loop body
LE: loop exit
PB: predicated region body
PF: predicated region fallthrough
CT: control target
= control target key end

     0   :  { %s3298_s0 = inlined_call_operand.vmem [shape: f32[4], index: 0, kind: input, shape index: {}]   ;;  %s3299_s1 = inlined_call_operand.vmem [shape: f32[4], index: 1, kind: input, shape index: {}]   ;;  %s3300_s2 = inlined_call_operand.<no memory space> [shape: s32[1], index: 2, kind: input, shape index: {}]   ;;  %s3301_s3 = inlined_call_operand.<no memory space> [shape: f32[1], index: 3, kind: input, shape index: {}]   ;;  %s3302_s4 = inlined_call_operand.hbm [shape: f32[2,4,256], index: 4, kind: input, shape index: {}, may-alias: {4,9}]   ;;  %s3303_s5 = inlined_call_operand.vmem [shape: f32[32,4], index: 5, kind: input, shape index: {}]   ;;  %s3304_s6 = inlined_call_operand.vmem [shape: f32[4,32], index: 6, kind: input, shape index: {}]   ;;  %s3305_s7 = inlined_call_operand.vmem [shape: f32[4,32,1], index: 7, kind: input, shape index: {}]   ;;  %s3306_s8 = inlined_call_operand.vmem [shape: f32[4,1], index: 8, kind: input, shape index: {}]   ;;  %s3307_s9 = inlined_call_operand.hbm [shape: f32[2,4,256], index: 9, kind: output, shape index: {}, may-alias: {4,9}]  }
   0x1   :  { %3314 = sst [smem:[#allocation19_spill]] %s3298_s0 }
   0x2   :  { %3315 = sst [smem:[#allocation20_spill]] %s3299_s1 }
   0x3   :  { %3316 = sst [smem:[#allocation21_spill]] %s3302_s4 }
   0x4   :  { %3317 = sst [smem:[#allocation22_spill]] %s3305_s7 }
   0x5   :  { %3318 = sst [smem:[#allocation23_spill]] %s3306_s8 }
   0x6   :  { %14 = sst [smem:[#allocation2]] %s3300_s2 }
   0x7   :  { %15 = sst [smem:[#allocation3]] %s3301_s3 }
   0x8   :  { %16 = vsyncpa [#allocation7], 0 }
   0x9   :  { %17 = vsyncpa [#allocation9], 0 }
   0xa   :  { %18 = vsyncpa [#allocation5], 0 }
   0xb   :  { %20 = vsyncpa [#allocation5 + $0x1], 0 }
   0xc   :  { %21 = vsyncpa [#allocation6], 0 }
   0xd   :  { %23 = vsyncpa [#allocation6 + $0x1], 0  ;;  %s2487_s13 = smov 0   ;;  %s2489_s14 = smov 0  }
   0xe   :  { %s2491_s15 = smov 0   ;;  %s2493_s16 = smov 0  }
   0xf   :  { %s2495_s17 = smov 0   ;;  %s2497_s2 = smov 0  }
  0x10   :  { %s2499_s18 = smov 0   ;;  %s2501_s3 = smov 0  }
  0x11 LB: > { %3319 = sst [smem:[#allocation16_spill]] %s2415_s2  ;;  %s1952_s19 = sadd.s32 4294967295, %s2423_s3   ;;  %s2423_s3 = sphi %s2501_s3, %s29_s3   ;;  %s2419_s18 = sphi %s2499_s18, %s3348_s18   ;;  %s2415_s2 = sphi %s2497_s2, %s3342_s2   ;;  %s2411_s17 = sphi %s2495_s17, %s3347_s17   ;;  %s2407_s16 = sphi %s2493_s16, %s3341_s16   ;;  %s2403_s15 = sphi %s2491_s15, %s3346_s15   ;;  %s2399_s14 = sphi %s2489_s14, %s3345_s14   ;;  %s2395_s13 = sphi %s2487_s13, %s3344_s13  }
  0x12   : > { %s1953_s20 = sadd.s32 4294967294, %s2423_s3   ;;  %p154_p0 = scmp.ne.s32.totalorder %s2399_s14, %s2395_s13 }
  0x13   : > { %p2531_p1 = scmp.eq.s32.totalorder %s1952_s19, 0  ;;  %p2535_p2 = scmp.eq.s32.totalorder %s1952_s19, 7 }
  0x14   : > { %p270_p3 = scmp.eq.s32.totalorder %s1953_s20, 7  ;;  %p1954_p5 = scmp.ge.s32.totalorder %s2423_s3, 1 }
  0x15   : > { %s3320_s21 = scalar_select %p2531_p1, 1, 0 }
  0x16   : > { %s3321_s22 = scalar_select %p2535_p2, 1, 0 }
  0x17   : > { %p2541_p4 = por %p2531_p1, %p154_p0  ;;  %p2546_p6 = por %p270_p3, %p154_p0 }
  0x18   : > { %p277_p7 = scmp.lt.s32.totalorder %s2423_s3, 9  ;;  %s3324_s0 = sld [smem:[#allocation19_spill]] }
  0x19   : > { %s3322_s23 = scalar_select %p2541_p4, 1, 0 }
  0x1a   : > { %s3323_s24 = scalar_select %p2546_p6, 1, 0 }
  0x1b   : > { %p2554_p8 = pnand %p1954_p5, %p277_p7  ;;  %s3326_s1 = sld [smem:[#allocation20_spill]] }
  0x1d   : > { %s3325_s28 = scalar_select %p2554_p8, 1, 0 }
  0x1e   : > { %s290_s27 = sshll.u32 %s3324_s0, 4  ;;  %p2064_p9 = pneg %p2554_p8  ;;  %s291_s27 = int_to_ptr.vmem [resolvable:$true] %s290_s27 }
  0x1f   : > { %s2257_s12 = scalar_lea.vmem %s291_s27, 16  ;;  %p2265_p3 = scmp.lt.s32.totalorder %s291_s27, %s291_s27 }
  0x20   : > { %p2565_p10 = pnand %p2064_p9, %p2531_p1  ;;  %p2258_p11 = scmp.ne.s32.totalorder %s291_s27, %s2257_s12 }
  0x21   : > { %s301_s10 = sshll.u32 %s3326_s1, 4  ;;  %p2266_p5 = scmp.lt.s32.totalorder %s2257_s12, %s2257_s12  ;;  %s302_s10 = int_to_ptr.vmem [resolvable:$true] %s301_s10 }
  0x22   : > { %p2259_p12 = pneg %p2565_p10 }
  0x23   : > { %p2267_p7 = por %p2266_p5, %p2265_p3 }
  0x24   : > { %p2260_p13 = pnand %p2259_p12, %p2258_p11 }
  0x26   : > { %p2261_p0 = pneg %p2260_p13 }
  0x28   : > { %p2268_p6 = pnand %p2267_p7, %p2261_p0 }
  0x2a   : > { %2271 = shalt.err (!%p2268_p6)
}
  0x2b   : > { %s2425_s19 = smov [#allocation4]   ;;  %s2272_s20 = scalar_lea.vmem %s302_s10, 16 }
  0x2c   : > { %2067 = dma.vmem_to_smem (!%p2565_p10), %s291_s27, 16, %s2425_s19, [#allocation7]  }
  0x2d   : > { %p2273_p9 = scmp.ne.s32.totalorder %s302_s10, %s2272_s20  ;;  %p2280_p8 = scmp.lt.s32.totalorder %s302_s10, %s302_s10 }
  0x2e   : > { %p2281_p2 = scmp.lt.s32.totalorder %s2272_s20, %s2272_s20 }
  0x2f   : > { %p2275_p4 = pnand %p2273_p9, %p2259_p12 }
  0x30   : > { %p2282_p11 = por %p2281_p2, %p2280_p8 }
  0x31   : > { %p2276_p1 = pneg %p2275_p4 }
  0x33   : > { %p2283_p13 = pnand %p2282_p11, %p2276_p1 }
  0x35   : > { %2286 = shalt.err (!%p2283_p13)
}
  0x36   : > { %s2426_s25 = smov [#allocation8]   ;;  %s41_s26 = sadd.s32 1, %s2415_s2 }
  0x37   : > { %2070 = dma.vmem_to_smem (!%p2565_p10), %s302_s10, 16, %s2426_s25, [#allocation9]  }
  0x38   : > { %s48_s27 = sadd.s32 1, %s2419_s18  ;;  %p42_p1 = scmp.ge.s32.totalorder %s41_s26, 4 }
  0x39   : > { %s141_s29 = sadd.s32 1, %s2403_s15  ;;  %p148_p2 = scmp.ne.s32.totalorder %s2403_s15, %s2399_s14 }
  0x3a   : > { %p149_p4 = scmp.eq.s32.totalorder %s2423_s3, 0  ;;  %s3350_s26 = smov (%p42_p1, %s41_s26), 0 }
  0x3b   : > { %3328 = sst [smem:[#allocation17_spill]] %s3350_s26  ;;  %s3352_s27 = smov (!%p42_p1, %s48_s27), %s2419_s18 }
  0x3c   : > { %p2584_p6 = por %p149_p4, %p148_p2  ;;  %p3330_p8 = scmp.ne.s32.totalorder %s3321_s22, 0 }
  0x3d   : > { %p50_p10 = scmp.ge.s32.totalorder %s3352_s27, 2  ;;  %p2081_p0 = scmp.lt.s32.totalorder %s2423_s3, 8 }
  0x3e   : > { %p2590_p12 = por %p3330_p8, %p148_p2  ;;  %s330_s10 = sand.u32 1, %s2403_s15  }
  0x3f   : > { %s2024_s12 = sshll.u32 %s2419_s18, 7  ;;  %s3354_s27 = smov (%p50_p10, %s3352_s27), 0 }
  0x40   : > { %3332 = sst [smem:[#allocation18_spill]] %s3354_s27  ;;  %s1958_s19 = sshll.u32 %s330_s10, 3 }
  0x41   : > { %s136_s20 = ssub.s32 %s2419_s18, %s3354_s27  ;;  %s3333_s4 = sld [smem:[#allocation21_spill]] }
  0x42   : > { %p139_p3 = scmp.eq.s32.totalorder %s136_s20, 0  ;;  %s334_s22 = scalar_lea.vmem [#allocation10], %s1958_s19 }
  0x43   : > { %s344_s26 = sshll.u32 %s334_s22, 4  ;;  %p2608_p5 = pnand %p2081_p0, %p2584_p6  ;;  %s2615_s26 = int_to_ptr.vmem [resolvable:$true] %s344_s26 }
  0x44   : > { %s2613_s27 = scalar_select %p139_p3, %s2403_s15, %s141_s29  }
  0x45   : > { %s331_s0 = scalar_lea.sflag [#allocation5], %s330_s10  ;;  %p2289_p9 = pneg %p2608_p5 }
  0x47   : > { %s2604_s1 = scalar_lea.hbm %s3333_s4, %s2024_s12  ;;  %s2292_s20 = scalar_lea.hbm %s3333_s4, 256 }
  0x48   : > { %s2287_s12 = scalar_lea.hbm %s2604_s1, 128  ;;  %p2293_p1 = scmp.lt.u32.totalorder %s2604_s1, %s3333_s4 }
  0x49   : > { %p2288_p7 = scmp.ne.s32.totalorder %s2604_s1, %s2287_s12  ;;  %p2294_p2 = scmp.lt.u32.totalorder %s2292_s20, %s2287_s12 }
  0x4a   : > { %p2296_p6 = scmp.lt.u32.totalorder %s2287_s12, %s2604_s1 }
  0x4b   : > { %p2290_p11 = pnand %p2289_p9, %p2288_p7  ;;  %p2295_p4 = por %p2294_p2, %p2293_p1 }
  0x4d   : > { %p2291_p13 = pneg %p2290_p11  ;;  %p2297_p8 = por %p2296_p6, %p2295_p4 }
  0x4f   : > { %p2298_p10 = pnand %p2297_p8, %p2291_p13 }
  0x51   : > { %2301 = shalt.err (!%p2298_p10)
}
  0x52   : > { %s2302_s29 = scalar_lea.vmem %s2615_s26, 128  ;;  %s2427_s10 = smov [#allocation10]  }
  0x53   : > { %p2303_p0 = scmp.ne.s32.totalorder %s2615_s26, %s2302_s29  ;;  %s2307_s30 = sshll.u32 %s2427_s10, 4  ;;  %s2308_s30 = int_to_ptr.vmem [resolvable:$false] %s2307_s30 }
  0x54   : > { %s2309_s19 = scalar_lea.vmem %s2308_s30, 256  ;;  %p2310_p11 = scmp.lt.s32.totalorder %s2615_s26, %s2308_s30 }
  0x55   : > { %p2305_p3 = pnand %p2303_p0, %p2289_p9  ;;  %p2311_p1 = scmp.lt.s32.totalorder %s2309_s19, %s2302_s29 }
  0x57   : > { %p2306_p7 = pneg %p2305_p3  ;;  %p2312_p2 = por %p2311_p1, %p2310_p11 }
  0x59   : > { %p2313_p4 = pnand %p2312_p2, %p2306_p7 }
  0x5b   : > { %2316 = shalt.err (!%p2313_p4)
}
  0x5c   : > { %2074 = dma.hbm_to_vmem [thread:$0]  (!%p2608_p5), %s2604_s1, 128, %s2615_s26, %s331_s0  }
  0x5d   : > { %p3335_p13 = scmp.ne.s32.totalorder %s3325_s28, 0 }
  0x5e   : > { %p3336_p9 = scmp.ne.s32.totalorder (!%p3335_p13), %s3320_s21, 0 }
  0x5f   : > { %353 = sbr.rel (%p3335_p13) target bundleno = 1594 (0x63a), region = 56 }
  0x66   : > { %2378 = dma.done.wait (%p3336_p9), [#allocation7], 16  }
  0x67   : > { %2380 = vsyncadd (%p3336_p9), [#allocation7], 4294967280 }
  0x68   : > { %2382 = dma.done.wait (%p3336_p9), [#allocation9], 16  }
  0x69   : > { %2384 = vsyncadd (%p3336_p9), [#allocation9], 4294967280  ;;  %s2653_s2 = sand.u32 1, %s2399_s14   ;;  %p3337_p5 = scmp.ne.s32.totalorder %s3322_s23, 0 }
  0x6a   : > { %s1964_s1 = sshll.u32 %s2653_s2, 3  ;;  %s364_s28 = scalar_lea.sflag [#allocation5], %s2653_s2 }
  0x6b   : > { %s367_s26 = scalar_lea.vmem [#allocation10], %s1964_s1 }
  0x6c   : > { %2386 = dma.done.wait (%p3337_p5), %s364_s28, 128  }
  0x6d   : > { %2388 = vsyncadd (%p3337_p5), %s364_s28, 4294967168 }
  0x6e   : > { %372 = sfence }
  0x6f   : > { %s2661_s0 = scalar_lea.vmem [#allocation11], %s1964_s1  ;;  %p1966_p6 = scmp.ne.s32.totalorder %s2407_s16, 0 }
  0x70   : > { %v409_v0 = vld [vmem:[%s367_s26] sm:$0xff] (!%p1966_p6) }
  0x71   : > { %408 = sbr.rel (%p1966_p6) target bundleno = 120 (0x78), region = 72  ;;  %410 = vst [vmem:[%s2661_s0] sm:$0xff] (!%p1966_p6), %v409_v0 }
  0x78 PF: > { %v2666_v1 = vld [vmem:[%s2661_s0] sm:$0xff]  ;;  %vm543_vm0 = vcmask 1043456   ;;  %v2428_v3 = vmov 0.0   ;;  %s1967_s21 = sshll.u32 %s2407_s16, 5  ;;  %v2676_v4 = vld [vmem:[%s3303_s5] sm:$0xff]  ;;  %vm530_vm1 = vcmask 31744  }
  0x79   : > { %v529_v2 = vcombine.high %v2666_v1, %v2666_v1  ;;  %612 = vmatprep.mubr.f32.mxu0 %v2428_v3  ;;  %624 = vmatprep.mubr.f32.mxu1 %v2428_v3  ;;  %v2681_v5 = vld [vmem:[%s3303_s5 + $0x10] sm:$0xff]  ;;  %v2429_v6 = vmov 0   ;;  %s3338_s7 = sld [smem:[#allocation22_spill]]  ;;  %v2701_v9 = vld [vmem:[%s3303_s5 + $0x8] sm:$0xff]  ;;  %v2706_v10 = vld [vmem:[%s3303_s5 + $0x18] sm:$0xff]  ;;  %s3339_s8 = sld [smem:[#allocation23_spill]] }
  0x7a   : > { %2153 = vset.pattern.permute.xlu0 %v2429_v6  ;;  %2154 = vset.pattern.permute.xlu1 %v2429_v6  ;;  %s454_s23 = sld [smem:[#allocation2]]  ;;  %s455_s12 = smul.u32 1663821227, %s2411_s17  ;;  %vm709_vm2 = vcmask 261120  }
  0x7b   : > { %1974 = vmatprep.subr.msk.mxu0 %vm543_vm0, %v529_v2  ;;  %2050 = vmatprep.subr.msk.mxu1 %vm543_vm0, %v529_v2 }
  0x7c   : > { %1975 = vmatpush1.msk.msra.mxu0 %vm543_vm0, %v2666_v1  ;;  %2051 = vmatpush1.msk.msra.mxu1 %vm543_vm0, %v2666_v1  ;;  %s456_s20 = sadd.s32 2135587861, %s455_s12 }
  0x7d   : > { %1976 = vmatmul.mubr.msk.f32.vlgmr.msra.gmra.mrb[0].mxu0 %vm530_vm1, %v2676_v4  ;;  %1978 = vmatmul.mubr.msk.f32.vlgmr.msra.gmra.mrb[0].mxu1 %vm530_vm1, %v2681_v5 }
  0x7e   : > { %618 = vmatprep.mubr.f32.mxu0 %v2428_v3  ;;  %630 = vmatprep.mubr.f32.mxu1 %v2428_v3 }
  0x7f   : > { %s421_s10 = scalar_lea.vmem %s3338_s7, %s1967_s21  ;;  %v446_v13 = vld [vmem:[%s3339_s8] sm:$0xf] }
  0x80   : > { %v422_v7 = vld [vmem:[%s421_s10] sm:$0xff]  ;;  %v424_v8 = vld [vmem:[%s421_s10 + $0x10] sm:$0xff]  ;;  %v423_v11 = vld [vmem:[%s421_s10 + $0x8] sm:$0xff]  ;;  %s457_s25 = sxor.u32 %s456_s20, %s454_s23 }
  0x81   : > { %428 = vperm.xlu0 %2153, %v422_v7   ;;  %438 = vperm.xlu1 %2154, %v424_v8   ;;  %v425_v12 = vld [vmem:[%s421_s10 + $0x18] sm:$0xff]  ;;  %s458_s22 = sshra.s32 %s457_s25, 16 }
  0x82   : > { %1977 = vmatmul.mubr.msk.f32.gmra.mrb[2].mxu0 %vm530_vm1, %v2701_v9  ;;  %1979 = vmatmul.mubr.msk.f32.gmra.mrb[2].mxu1 %vm530_vm1, %v2706_v10  ;;  %s459_s29 = sand.u32 65535, %s458_s22 }
  0x83   : > { %777 = vmatprep.mubr.f32.mxu1 %v2428_v3  ;;  %1201 = vmatprep.mubr.f32.mxu0 %v2428_v3  ;;  %s460_s10 = sxor.u32 %s459_s29, %s457_s25 }
  0x84   : > { %s461_s30 = smul.u32 73244475, %s460_s10 }
  0x85   : > { %433 = vperm.xlu0 %2153, %v423_v11   ;;  %443 = vperm.xlu1 %2154, %v425_v12   ;;  %s483_s10 = smul.u32 1663821227, %s2407_s16 }
  0x86   : > { %s462_s19 = sshra.s32 %s461_s30, 16 }
  0x87   : > { %s463_s1 = sand.u32 65535, %s462_s19 }
  0x88   : > { %s464_s28 = sxor.u32 %s463_s1, %s461_s30  ;;  %s484_s1 = sadd.s32 2135587861, %s483_s10 }
  0x89   : > { %449 = vperm.xlu0 %2153, %v446_v13   ;;  %s465_s4 = smul.u32 73244475, %s464_s28 }
  0x8b   : > { %s466_s7 = sshra.s32 %s465_s4, 16 }
  0x8c   : > { %s467_s26 = sand.u32 65535, %s466_s7 }
  0x8d   : > { %s468_s21 = sxor.u32 %s467_s26, %s465_s4 }
  0x8e   : > { %s471_s8 = sxor.u32 2135587861, %s468_s21 }
  0x8f   : > { %s472_s12 = sshra.s32 %s471_s8, 16 }
  0x90   : > { %s473_s23 = sand.u32 65535, %s472_s12 }
  0x91   : > { %s474_s4 = sxor.u32 %s473_s23, %s471_s8 }
  0x92   : > { %s475_s7 = smul.u32 73244475, %s474_s4 }
  0x94   : > { %s476_s8 = sshra.s32 %s475_s7, 16 }
  0x95   : > { %s477_s20 = sand.u32 65535, %s476_s8 }
  0x96   : > { %s478_s25 = sxor.u32 %s477_s20, %s475_s7 }
  0x97   : > { %s2770_s22 = smul.u32 73244475, %s478_s25 }
  0x99   : > { %s480_s29 = sshra.s32 %s2770_s22, 16 }
  0x9a   : > { %s481_s30 = sand.u32 65535, %s480_s29 }
  0x9b   : > { %s482_s19 = sxor.u32 %s481_s30, %s2770_s22 }
  0x9c   : > { %s485_s28 = sxor.u32 %s484_s1, %s482_s19 }
  0x9d   : > { %s486_s26 = sshra.s32 %s485_s28, 16 }
  0x9e   : > { %s487_s21 = sand.u32 65535, %s486_s26 }
  0x9f   : > { %s488_s12 = sxor.u32 %s487_s21, %s485_s28 }
  0xa0   : > { %s489_s23 = smul.u32 73244475, %s488_s12 }
  0xa2   : > { %s490_s4 = sshra.s32 %s489_s23, 16 }
  0xa3   : > { %s491_s7 = sand.u32 65535, %s490_s4 }
  0xa4   : > { %s492_s8 = sxor.u32 %s491_s7, %s489_s23 }
  0xa5   : > { %s493_s20 = smul.u32 73244475, %s492_s8 }
  0xa7   : > { %s494_s25 = sshra.s32 %s493_s20, 16 }
  0xa8   : > { %s495_s22 = sand.u32 65535, %s494_s25  ;;  %s411_s25 = sld [smem:[#allocation4 + %s2407_s16]] }
  0xa9   : > { %s2787_s29 = sxor.u32 %s495_s22, %s493_s20  ;;  %s413_s22 = sld [smem:[#allocation3]] }
  0xaa   : > { %s784_s10 = sshra.s32 %s2787_s29, 16 }
  0xab   : > { %s785_s30 = sand.u32 65535, %s784_s10 }
  0xac   : > { %s786_s19 = sxor.u32 %s785_s30, %s2787_s29  ;;  %s412_s30 = sld [smem:[#allocation8 + %s2407_s16]] }
  0xad   : > { %s787_s1 = smul.u32 73244475, %s786_s19  ;;  %s1208_s16 = sadd.s32 1374868397, %s2787_s29 }
  0xae   : > { %s1209_s19 = sshra.s32 %s1208_s16, 16 }
  0xaf   : > { %s788_s28 = sshra.s32 %s787_s1, 16  ;;  %s414_s10 = smul.f32 %s413_s22, %s411_s25 }
  0xb0   : > { %s789_s26 = sand.u32 65535, %s788_s28 }
  0xb1   : > { %s790_s21 = sxor.u32 %s789_s26, %s787_s1  ;;  %s1210_s1 = sand.u32 65535, %s1209_s19 }
  0xb2   : > { %s791_s12 = smul.u32 73244475, %s790_s21  ;;  %s1211_s28 = sxor.u32 %s1210_s1, %s1208_s16 }
  0xb3   : > { %s1212_s26 = smul.u32 73244475, %s1211_s28  ;;  %s2025_s19 = sshll.u32 %s2411_s17, 7 }
  0xb4   : > { %s792_s23 = sshra.s32 %s791_s12, 16  ;;  %s1838_s1 = sshll.u32 %s2661_s0, 4  ;;  %s3245_s1 = int_to_ptr.vmem [resolvable:$true] %s1838_s1 }
  0xb5   : > { %s793_s4 = sand.u32 65535, %s792_s23  ;;  %s1213_s21 = sshra.s32 %s1212_s26, 16 }
  0xb6   : > { %s794_s7 = sxor.u32 %s793_s4, %s791_s12  ;;  %s1214_s12 = sand.u32 65535, %s1213_s21 }
  0xb7   : > { %s1215_s23 = sxor.u32 %s1214_s12, %s1212_s26  ;;  %s1633_s26 = sadd.s32 2749736794, %s2787_s29 }
  0xb8   : > { %s1216_s4 = smul.u32 73244475, %s1215_s23  ;;  %s1634_s21 = sshra.s32 %s1633_s26, 16 }
  0xb9   : > { %s1635_s12 = sand.u32 65535, %s1634_s21  ;;  %s3243_s21 = scalar_lea.hbm %s3307_s9, %s2025_s19 }
  0xba   : > { %s1636_s23 = sxor.u32 %s1635_s12, %s1633_s26  ;;  %s1822_s12 = scalar_lea.sflag [#allocation6], %s2653_s2 }
  0xbb   : > { %s2430_s17 = smov [#allocation11]  }
 0x100   : > { %v2718_v14 = vpop.permute.xlu1 %438  ;;  %v2720_v15 = vpop.permute.xlu0 %428 }
 0x104   : > { %v2734_v24 = vpop.permute.xlu1 %443  ;;  %v2736_v25 = vpop.permute.xlu0 %433 }
 0x150   : > { %v614_v16 = vpop.f32.mrb[0].mxu0  ;;  %v626_v17 = vpop.f32.mrb[0].mxu1 }
 0x151   : > { %v2723_v18 = vadd.f32 %v614_v16, %v2720_v15  ;;  %v2726_v19 = vadd.f32 %v626_v17, %v2718_v14  ;;  %v616_v20 = vpop.f32.mrb[1].mxu0  ;;  %v628_v21 = vpop.f32.mrb[1].mxu1 }
 0x152   : > { %v2729_v22 = vadd.f32 %v616_v20, %v2720_v15  ;;  %v2732_v23 = vadd.f32 %v628_v21, %v2718_v14  ;;  %v497_v20 = vlaneseq }
 0x153   : > { %v637_v26 = vmul.f32 %v2723_v18, %v2723_v18  ;;  %v641_v27 = vmul.f32 %v2726_v19, %v2726_v19 }
 0x154   : > { %v638_v28 = vmul.f32 %v2729_v22, %v2729_v22  ;;  %v642_v29 = vmul.f32 %v2732_v23, %v2732_v23  ;;  %v498_v21 = vshrl.u32 %v497_v20, 7 }
 0x155   : > { %v620_v30 = vpop.f32.mrb[2].mxu0  ;;  %v632_v31 = vpop.f32.mrb[2].mxu1  ;;  %v645_v32 = vmul.f32 %v637_v26, %v2723_v18  ;;  %v649_v33 = vmul.f32 %v641_v27, %v2726_v19  ;;  %v500_v26 = vand.u32 127, %v497_v20 }
 0x156   : > { %v2749_v34 = vadd.f32 %v620_v30, %v2736_v25  ;;  %v2752_v35 = vadd.f32 %v632_v31, %v2734_v24  ;;  %v622_v36 = vpop.f32.mrb[3].mxu0  ;;  %v634_v37 = vpop.f32.mrb[3].mxu1  ;;  %v646_v38 = vmul.f32 %v638_v28, %v2729_v22  ;;  %v650_v39 = vmul.f32 %v642_v29, %v2732_v23 }
 0x157   : > { %v2757_v40 = vadd.f32 %v622_v36, %v2736_v25  ;;  %v2760_v41 = vadd.f32 %v634_v37, %v2734_v24  ;;  %v653_v42 = vmul.f32 0.044715, %v645_v32  ;;  %v657_v43 = vmul.f32 0.044715, %v649_v33 }
 0x158   : > { %v639_v44 = vmul.f32 %v2749_v34, %v2749_v34  ;;  %v643_v45 = vmul.f32 %v2752_v35, %v2752_v35  ;;  %v654_v46 = vmul.f32 0.044715, %v646_v38  ;;  %v658_v47 = vmul.f32 0.044715, %v650_v39 }
 0x159   : > { %v640_v48 = vmul.f32 %v2757_v40, %v2757_v40  ;;  %v644_v49 = vmul.f32 %v2760_v41, %v2760_v41  ;;  %v661_v50 = vadd.f32 %v653_v42, %v2723_v18  ;;  %v665_v51 = vadd.f32 %v657_v43, %v2726_v19 }
 0x15a   : > { %v647_v52 = vmul.f32 %v639_v44, %v2749_v34  ;;  %v651_v53 = vmul.f32 %v643_v45, %v2752_v35  ;;  %v662_v54 = vadd.f32 %v654_v46, %v2729_v22  ;;  %v666_v55 = vadd.f32 %v658_v47, %v2732_v23 }
 0x15b   : > { %v648_v56 = vmul.f32 %v640_v48, %v2757_v40  ;;  %v652_v57 = vmul.f32 %v644_v49, %v2760_v41  ;;  %v669_v58 = vmul.f32 0.7978846, %v661_v50  ;;  %v673_v59 = vmul.f32 0.7978846, %v665_v51 }
 0x15c   : > { %v655_v60 = vmul.f32 0.044715, %v647_v52  ;;  %v670_v61 = vmul.f32 0.7978846, %v662_v54  ;;  %v674_v62 = vmul.f32 0.7978846, %v666_v55 }
 0x15d   : > { %v659_v63 = vmul.f32 0.044715, %v651_v53  ;;  %2156 = vtanh.f32 %v669_v58  ;;  %v656_v2 = vmul.f32 0.044715, %v648_v56  ;;  %v660_v6 = vmul.f32 0.044715, %v652_v57 }
 0x15e   : > { %v663_v0 = vadd.f32 %v655_v60, %v2749_v34  ;;  %2158 = vtanh.f32 %v673_v59  ;;  %v501_v27 = vadd.s32 128, %v500_v26  ;;  %v502_v28 = vmul.u32 256, %v498_v21 }
 0x15f   : > { %v667_v7 = vadd.f32 %v659_v63, %v2752_v35  ;;  %2160 = vtanh.f32 %v670_v61  ;;  %v664_v11 = vadd.f32 %v656_v2, %v2757_v40  ;;  %v668_v12 = vadd.f32 %v660_v6, %v2760_v41 }
 0x160   : > { %v671_v8 = vmul.f32 0.7978846, %v663_v0  ;;  %2162 = vtanh.f32 %v674_v62  ;;  %v503_v30 = vadd.s32 %v502_v28, %v500_v26  ;;  %v504_v31 = vadd.s32 %v502_v28, %v501_v27 }
 0x161   : > { %v675_v13 = vmul.f32 0.7978846, %v667_v7  ;;  %v672_v16 = vmul.f32 0.7978846, %v664_v11  ;;  %v676_v17 = vmul.f32 0.7978846, %v668_v12 }
 0x162   : > { %2164 = vtanh.f32 %v671_v8  ;;  %v1968_v38 = vshrl.u32 %v503_v30, 16  ;;  %v1969_v39 = vshrl.u32 %v504_v31, 16 }
 0x163   : > { %2166 = vtanh.f32 %v675_v13 }
 0x164   : > { %2168 = vtanh.f32 %v672_v16  ;;  %v509_v46 = vxor.u32 %v1968_v38, %v503_v30  ;;  %v510_v47 = vxor.u32 %v1969_v39, %v504_v31 }
 0x165   : > { %2170 = vtanh.f32 %v676_v17 }
 0x166   : > { %v511_v54 = vmul.u32 73244475, %v509_v46  ;;  %v512_v59 = vmul.u32 73244475, %v510_v47 }
 0x167   : > { %v2157_v29 = vpop.eup %2156 }
 0x168   : > { %v2159_v32 = vpop.eup %2158  ;;  %v685_v33 = vadd.f32 1.0, %v2157_v29  ;;  %v1970_v63 = vshrl.u32 %v511_v54, 16  ;;  %v1971_v7 = vshrl.u32 %v512_v59, 16 }
 0x169   : > { %v2161_v36 = vpop.eup %2160  ;;  %v689_v37 = vadd.f32 1.0, %v2159_v32 }
 0x16a   : > { %v2163_v42 = vpop.eup %2162  ;;  %v686_v43 = vadd.f32 1.0, %v2161_v36  ;;  %v693_v49 = vmul.f32 0.5, %v685_v33  ;;  %v517_v13 = vxor.u32 %v1970_v63, %v511_v54  ;;  %v518_v21 = vxor.u32 %v1971_v7, %v512_v59 }
 0x16b   : > { %v690_v45 = vadd.f32 1.0, %v2163_v42  ;;  %v697_v52 = vmul.f32 0.5, %v689_v37 }
 0x16c   : > { %v2165_v44 = vpop.eup %2164  ;;  %v694_v58 = vmul.f32 0.5, %v686_v43  ;;  %v701_v0 = vmul.f32 %v693_v49, %v2723_v18  ;;  %v519_v27 = vmul.u32 73244475, %v517_v13 }
 0x16d   : > { %v2167_v48 = vpop.eup %2166  ;;  %v687_v50 = vadd.f32 1.0, %v2165_v44  ;;  %v698_v62 = vmul.f32 0.5, %v690_v45  ;;  %v705_v8 = vmul.f32 %v697_v52, %v2726_v19  ;;  %v520_v19 = vmul.u32 73244475, %v518_v21 }
 0x16e   : > { %v2169_v51 = vpop.eup %2168  ;;  %v691_v53 = vadd.f32 1.0, %v2167_v48  ;;  %v702_v16 = vmul.f32 %v694_v58, %v2729_v22  ;;  %v1972_v29 = vshrl.u32 %v519_v27, 16 }
 0x16f   : > { %v2171_v55 = vpop.eup %2170  ;;  %v695_v56 = vmul.f32 0.5, %v687_v50  ;;  %v688_v57 = vadd.f32 1.0, %v2169_v51  ;;  %v706_v18 = vmul.f32 %v698_v62, %v2732_v23  ;;  %v1973_v22 = vshrl.u32 %v520_v19, 16 }
 0x170   : > { %v699_v60 = vmul.f32 0.5, %v691_v53  ;;  %v692_v61 = vadd.f32 1.0, %v2171_v55  ;;  %v795_v23 = vstv %s794_s7  ;;  %s1217_s7 = sshra.s32 %s1216_s4, 16 }
 0x171   : > { %v703_v2 = vmul.f32 %v695_v56, %v2749_v34  ;;  %v696_v6 = vmul.f32 0.5, %v688_v57  ;;  %v2801_v30 = vxor.u32 %v1973_v22, %v520_v19  ;;  %s1218_s8 = sand.u32 65535, %s1217_s7 }
 0x172   : > { %v707_v11 = vmul.f32 %v699_v60, %v2752_v35  ;;  %v700_v12 = vmul.f32 0.5, %v692_v61  ;;  %s1219_s20 = sxor.u32 %s1218_s8, %s1216_s4  ;;  %s1637_s4 = smul.u32 73244475, %s1636_s23 }
 0x173   : > { %v704_v17 = vmul.f32 %v696_v6, %v2757_v40  ;;  %v2028_v20 = vpack.c.bf16 %v703_v2, %v701_v0  ;;  %v2799_v40 = vxor.u32 %v1972_v29, %v519_v27  ;;  %v797_v32 = vxor.u32 %v795_v23, %v2801_v30  ;;  %s2317_s23 = scalar_lea.vmem %s3245_s1, 128 }
 0x174   : > { %v708_v34 = vmul.f32 %v700_v12, %v2760_v41  ;;  %v2032_v26 = vpack.c.bf16 %v707_v11, %v705_v8  ;;  %v2806_v41 = vld [vmem:[%s3304_s6] sm:$0xf]  ;;  %s1638_s29 = sshra.s32 %s1637_s4, 16  ;;  %p2318_p8 = scmp.ne.s32.totalorder %s3245_s1, %s2317_s23 }
 0x175   : > { %v2026_v28 = vpack.c.bf16 %v704_v17, %v702_v16  ;;  %v796_v31 = vxor.u32 %v795_v23, %v2799_v40  ;;  %v1982_v36 = vshrl.u32 %v797_v32, 16  ;;  %s1639_s7 = sand.u32 65535, %s1638_s29 }
 0x176   : > { %v2030_v35 = vpack.c.bf16 %v708_v34, %v706_v18  ;;  %s1640_s8 = sxor.u32 %s1639_s7, %s1637_s4  ;;  %p2319_p10 = pnand %p2318_p8, %p2590_p12 }
 0x177   : > { %2027 = vmatprep.subr.bf16.mxu1 %v2026_v28  ;;  %v1981_v33 = vshrl.u32 %v796_v31, 16  ;;  %v803_v38 = vxor.u32 %v1982_v36, %v797_v32  ;;  %s2321_s4 = sshll.u32 %s2430_s17, 4  ;;  %s2322_s4 = int_to_ptr.vmem [resolvable:$false] %s2321_s4 }
 0x178   : > { %2029 = vmatpush1.bf16.msra.mxu1 %v2028_v20  ;;  %p2320_p0 = pneg %p2319_p10  ;;  %s2323_s29 = scalar_lea.vmem %s2322_s4, 256 }
 0x179   : > { %2031 = vmatprep.subr.bf16.mxu1 %v2030_v35  ;;  %v802_v37 = vxor.u32 %v1981_v33, %v796_v31  ;;  %v805_v42 = vmul.u32 73244475, %v803_v38  ;;  %p2324_p3 = scmp.lt.s32.totalorder %s3245_s1, %s2322_s4  ;;  %p2325_p7 = scmp.lt.s32.totalorder %s2323_s29, %s2317_s23 }
 0x17b   : > { %v804_v39 = vmul.u32 73244475, %v802_v37  ;;  %v1984_v44 = vshrl.u32 %v805_v42, 16  ;;  %p2326_p11 = por %p2325_p7, %p2324_p3 }
 0x17c   : > { %2033 = vmatpush1.bf16.msra.mxu1 %v2032_v26 }
 0x17d   : > { %v1983_v43 = vshrl.u32 %v804_v39, 16  ;;  %v811_v46 = vxor.u32 %v1984_v44, %v805_v42  ;;  %p2327_p1 = pnand %p2326_p11, %p2320_p0 }
 0x17f   : > { %1980 = vmatmul.mubr.msk.f32.vlgmr.msra.gmra.mrb[4].mxu1 %vm709_vm2, %v2806_v41  ;;  %v810_v45 = vxor.u32 %v1983_v43, %v804_v39  ;;  %v813_v48 = vmul.u32 73244475, %v811_v46 }
 0x180   : > { %1040 = vmatprep.mubr.f32.mxu1 %v2428_v3 }
 0x181   : > { %v812_v47 = vmul.u32 73244475, %v810_v45  ;;  %v1986_v50 = vshrl.u32 %v813_v48, 16 }
 0x183   : > { %v1985_v49 = vshrl.u32 %v812_v47, 16  ;;  %v819_v52 = vxor.u32 %v1986_v50, %v813_v48 }
 0x185   : > { %v818_v51 = vxor.u32 %v1985_v49, %v812_v47  ;;  %v821_v54 = vand.u32 2147483647, %v819_v52 }
 0x187   : > { %v820_v53 = vand.u32 2147483647, %v818_v51  ;;  %v823_v56 = vshra.s32 %v821_v54, 8 }
 0x189   : > { %v822_v55 = vshra.s32 %v820_v53, 8  ;;  %v825_v58 = vcvt.s32.f32 %v823_v56 }
 0x18b   : > { %v824_v57 = vcvt.s32.f32 %v822_v55  ;;  %v827_v60 = vadd.f32 0.5, %v825_v58 }
 0x18d   : > { %v826_v59 = vadd.f32 0.5, %v824_v57  ;;  %v2815_v62 = vmul.f32 1.1920929e-07, %v827_v60 }
 0x18f   : > { %v2813_v61 = vmul.f32 1.1920929e-07, %v826_v59  ;;  %v881_v0 = vsub.f32 1.0, %v2815_v62  ;;  %v2825_v20 = vadd.f32 -0.5, %v2815_v62  ;;  %vm945_vm9 = vcmp.lt.f32.partialorder %v2815_v62, 0.5 }
 0x191   : > { %v880_v63 = vsub.f32 1.0, %v2813_v61  ;;  %v883_v6 = vmin.f32 %v2815_v62, %v881_v0  ;;  %v2822_v17 = vadd.f32 -0.5, %v2813_v61  ;;  %v2833_v34 = vmul.f32 %v2825_v20, %v2825_v20 }
 0x192   : > { %vm944_vm7 = vcmp.lt.f32.partialorder %v2813_v61, 0.5 }
 0x193   : > { %v882_v2 = vmin.f32 %v2813_v61, %v880_v63  ;;  %v2829_v18 = vmul.f32 %v2822_v17, %v2822_v17  ;;  %v857_v35 = vmul.f32 -54.476097, %v2833_v34  ;;  %v835_v54 = vmul.f32 -39.69683, %v2833_v34 }
 0x195   : > { %2172 = vlog2.f32 %v882_v2  ;;  %v856_v19 = vmul.f32 -54.476097, %v2829_v18  ;;  %v859_v32 = vadd.f32 161.58583, %v857_v35  ;;  %v834_v53 = vmul.f32 -39.69683, %v2829_v18 }
 0x196   : > { %2174 = vlog2.f32 %v883_v6  ;;  %v837_v63 = vadd.f32 220.9461, %v835_v54 }
 0x197   : > { %v858_v31 = vadd.f32 161.58583, %v856_v19  ;;  %v861_v42 = vmul.f32 %v859_v32, %v2833_v34  ;;  %v836_v60 = vadd.f32 220.9461, %v834_v53 }
 0x199   : > { %v860_v39 = vmul.f32 %v858_v31, %v2829_v18  ;;  %v863_v46 = vadd.f32 -155.69897, %v861_v42 }
 0x19b   : > { %v862_v45 = vadd.f32 -155.69897, %v860_v39  ;;  %v865_v50 = vmul.f32 %v863_v46, %v2833_v34 }
 0x19d   : > { %v864_v49 = vmul.f32 %v862_v45, %v2829_v18  ;;  %v867_v58 = vadd.f32 66.801315, %v865_v50 }
 0x19f   : > { %v2173_v7 = vpop.eup %2172  ;;  %v866_v57 = vadd.f32 66.801315, %v864_v49 }
 0x1a0   : > { %v2175_v8 = vpop.eup %2174  ;;  %v885_v11 = vmul.f32 0.6931472, %v2173_v7  ;;  %v869_v7 = vmul.f32 %v867_v58, %v2833_v34 }
 0x1a1   : > { %v887_v12 = vmul.f32 0.6931472, %v2175_v8  ;;  %v868_v6 = vmul.f32 %v866_v57, %v2829_v18 }
 0x1a2   : > { %v888_v13 = vmul.f32 -2.0, %v885_v11 }
 0x1a3   : > { %v889_v16 = vmul.f32 -2.0, %v887_v12  ;;  %v838_v12 = vmul.f32 %v836_v60, %v2829_v18 }
 0x1a4   : > { %2176 = vrsqrt.f32 %v888_v13  ;;  %vm892_vm3 = vcmp.eq.f32.partialorder %v888_v13, inf  ;;  %v895_v26 = vand.u32 2147483648, %v888_v13  ;;  %vm894_vm4 = vcmp.eq.f32.partialorder %v888_v13, 0.0 }
 0x1a5   : > { %2178 = vrsqrt.f32 %v889_v16  ;;  %vm899_vm5 = vcmp.eq.f32.partialorder %v889_v16, inf  ;;  %vm901_vm6 = vcmp.eq.f32.partialorder %v889_v16, 0.0  ;;  %v902_v22 = vand.u32 2147483648, %v889_v16 }
 0x1a6   : > { %v840_v35 = vadd.f32 -275.9285, %v838_v12 }
 0x1a8   : > { %v842_v39 = vmul.f32 %v840_v35, %v2829_v18 }
 0x1aa   : > { %v844_v49 = vadd.f32 138.35776, %v842_v39  ;;  %v2889_v39 = vpop.permute.xlu0 %449 }
 0x1ac   : > { %v846_v54 = vmul.f32 %v844_v49, %v2829_v18 }
 0x1ae   : > { %v2177_v21 = vpop.eup %2176  ;;  %v848_v58 = vadd.f32 -30.664799, %v846_v54 }
 0x1af   : > { %v2179_v27 = vpop.eup %2178  ;;  %v891_v28 = vmul.f32 %v2177_v21, %v888_v13 }
 0x1b0   : > { %v898_v29 = vmul.f32 %v2179_v27, %v889_v16  ;;  %v871_v27 = vadd.f32 -13.280682, %v869_v7 }
 0x1b1   : > { %v893_v23 = vsel %vm892_vm3, %v888_v13, %v891_v28  ;;  %v839_v13 = vmul.f32 %v837_v63, %v2833_v34 }
 0x1b2   : > { %v2837_v33 = vsel %vm894_vm4, %v895_v26, %v893_v23  ;;  %v900_v36 = vsel %vm899_vm5, %v889_v16, %v898_v29  ;;  %v870_v26 = vadd.f32 -13.280682, %v868_v6  ;;  %v873_v32 = vmul.f32 %v871_v27, %v2833_v34 }
 0x1b3   : > { %v2839_v37 = vsel %vm901_vm6, %v902_v22, %v900_v36  ;;  %v924_v38 = vmul.f32 0.007784696, %v2837_v33  ;;  %v904_v51 = vmul.f32 -0.007784894, %v2837_v33  ;;  %v841_v29 = vadd.f32 -275.9285, %v839_v13 }
 0x1b4   : > { %v925_v43 = vmul.f32 0.007784696, %v2839_v37  ;;  %v905_v52 = vmul.f32 -0.007784894, %v2839_v37  ;;  %v872_v31 = vmul.f32 %v870_v26, %v2829_v18  ;;  %v875_v46 = vadd.f32 1.0, %v873_v32 }
 0x1b5   : > { %v926_v44 = vadd.f32 0.32246712, %v924_v38  ;;  %v906_v59 = vadd.f32 -0.32239646, %v904_v51  ;;  %v843_v42 = vmul.f32 %v841_v29, %v2833_v34  ;;  %v2883_v29 = vstv %s414_s10 }
 0x1b6   : > { %v927_v47 = vadd.f32 0.32246712, %v925_v43  ;;  %v907_v0 = vadd.f32 -0.32239646, %v905_v52  ;;  %v874_v45 = vadd.f32 1.0, %v872_v31 }
 0x1b7   : > { %v928_v48 = vmul.f32 %v926_v44, %v2837_v33  ;;  %v908_v8 = vmul.f32 %v906_v59, %v2837_v33  ;;  %v845_v50 = vadd.f32 138.35776, %v843_v42  ;;  %v2891_v42 = vstv %s412_s30 }
 0x1b8   : > { %v929_v55 = vmul.f32 %v927_v47, %v2839_v37  ;;  %v909_v16 = vmul.f32 %v907_v0, %v2839_v37  ;;  %v850_v0 = vmul.f32 %v848_v58, %v2829_v18 }
 0x1b9   : > { %v930_v56 = vadd.f32 2.4451342, %v928_v48  ;;  %v910_v28 = vadd.f32 -2.4007583, %v908_v8 }
 0x1ba   : > { %v931_v11 = vadd.f32 2.4451342, %v929_v55  ;;  %v911_v22 = vadd.f32 -2.4007583, %v909_v16  ;;  %v847_v55 = vmul.f32 %v845_v50, %v2833_v34  ;;  %v852_v8 = vadd.f32 2.5066283, %v850_v0 }
 0x1bb   : > { %v932_v2 = vmul.f32 %v930_v56, %v2837_v33  ;;  %v912_v36 = vmul.f32 %v910_v28, %v2837_v33 }
 0x1bc   : > { %v933_v19 = vmul.f32 %v931_v11, %v2839_v37  ;;  %v913_v43 = vmul.f32 %v911_v22, %v2839_v37  ;;  %v849_v59 = vadd.f32 -30.664799, %v847_v55  ;;  %v854_v13 = vmul.f32 %v2822_v17, %v852_v8 }
 0x1bd   : > { %v934_v21 = vadd.f32 3.7544086, %v932_v2  ;;  %v914_v47 = vadd.f32 -2.5497324, %v912_v36 }
 0x1be   : > { %v935_v38 = vadd.f32 3.7544086, %v933_v19  ;;  %v915_v51 = vadd.f32 -2.5497324, %v913_v43  ;;  %v851_v2 = vmul.f32 %v849_v59, %v2833_v34  ;;  %v951_v34 = vand.u32 2147483647, %v2825_v20 }
 0x1bf   : > { %v936_v23 = vmul.f32 %v934_v21, %v2837_v33  ;;  %v916_v52 = vmul.f32 %v914_v47, %v2837_v33 }
 0x1c0   : > { %v937_v48 = vmul.f32 %v935_v38, %v2839_v37  ;;  %v917_v56 = vmul.f32 %v915_v51, %v2839_v37  ;;  %v853_v11 = vadd.f32 2.5066283, %v851_v2  ;;  %vm953_vm10 = vcmp.le.f32.partialorder %v951_v34, 0.47575 }
 0x1c1   : > { %v938_v44 = vadd.f32 1.0, %v936_v23  ;;  %v918_v57 = vadd.f32 4.3746643, %v916_v52 }
 0x1c2   : > { %v939_v53 = vadd.f32 1.0, %v937_v48  ;;  %v919_v60 = vadd.f32 4.3746643, %v917_v56  ;;  %v855_v26 = vmul.f32 %v2825_v20, %v853_v11 }
 0x1c3   : > { %2180 = vrcp.f32 %v938_v44  ;;  %v920_v63 = vmul.f32 %v918_v57, %v2837_v33  ;;  %v950_v33 = vand.u32 2147483647, %v2822_v17 }
 0x1c4   : > { %2182 = vrcp.f32 %v874_v45  ;;  %v921_v6 = vmul.f32 %v919_v60, %v2839_v37 }
 0x1c5   : > { %2184 = vrcp.f32 %v875_v46  ;;  %v922_v7 = vadd.f32 2.938164, %v920_v63  ;;  %vm952_vm8 = vcmp.le.f32.partialorder %v950_v33, 0.47575 }
 0x1c6   : > { %2186 = vrcp.f32 %v939_v53  ;;  %v923_v16 = vadd.f32 2.938164, %v921_v6 }
 0x1cd   : > { %v2181_v12 = vpop.eup %2180 }
 0x1ce   : > { %v2183_v21 = vpop.eup %2182  ;;  %v941_v27 = vmul.f32 %v2181_v12, %v922_v7 }
 0x1cf   : > { %v2185_v28 = vpop.eup %2184  ;;  %v877_v18 = vmul.f32 %v2183_v21, %v854_v13 }
 0x1d0   : > { %v2187_v37 = vpop.eup %2186  ;;  %v946_v19 = vsub.f32 0.0, %v941_v27  ;;  %v879_v22 = vmul.f32 %v2185_v28, %v855_v26 }
 0x1d1   : > { %v943_v35 = vmul.f32 %v2187_v37, %v923_v16 }
 0x1d2   : > { %v948_v23 = vsel %vm944_vm7, %v941_v27, %v946_v19 }
 0x1d3   : > { %v947_v31 = vsub.f32 0.0, %v943_v35  ;;  %v954_v17 = vsel %vm952_vm8, %v877_v18, %v948_v23 }
 0x1d4   : > { %v963_v36 = vmul.f32 %v954_v17, %v2883_v29 }
 0x1d5   : > { %v949_v32 = vsel %vm945_vm9, %v943_v35, %v947_v31 }
 0x1d6   : > { %v955_v61 = vsel %vm953_vm10, %v879_v22, %v949_v32 }
 0x1d7   : > { %v964_v20 = vmul.f32 %v955_v61, %v2883_v29 }
 0x1d9   : > { %v967_v38 = vcombine.low %v963_v36, %v964_v20 }
 0x252   : > { %v779_v43 = vpop.f32.mrb[4].mxu1 }
 0x253   : > { %v780_v44 = vadd.f32 %v779_v43, %v2889_v39  ;;  %v781_v62 = vpop.f32.mrb[5].mxu1 }
 0x254   : > { %v782_v45 = vadd.f32 %v781_v62, %v2889_v39 }
 0x255   : > { %v956_v46 = vmul.f32 %v780_v44, %v2891_v42 }
 0x256   : > { %v957_v47 = vmul.f32 %v782_v45, %v2891_v42 }
 0x258   : > { %v960_v48 = vcombine.low %v956_v46, %v957_v47 }
 0x25a   : > { %v962_v49 = vadd.f32 %v960_v48, %v2666_v1 }
 0x25c   : > { %v2898_v50 = vadd.f32 %v967_v38, %v962_v49 }
 0x25e   : > { %v971_v51 = vcombine.high %v2898_v50, %v2898_v50 }
 0x260   : > { %1989 = vmatprep.subr.msk.mxu1 %vm543_vm0, %v971_v51 }
 0x261   : > { %1990 = vmatpush1.msk.msra.mxu1 %vm543_vm0, %v2898_v50 }
 0x262   : > { %1991 = vmatmul.mubr.msk.f32.vlgmr.msra.gmra.mrb[6].mxu1 %vm530_vm1, %v2676_v4 }
 0x263   : > { %1046 = vmatprep.mubr.f32.mxu1 %v2428_v3 }
 0x266   : > { %1992 = vmatmul.mubr.msk.f32.gmra.mrb[8].mxu1 %vm530_vm1, %v2701_v9 }
 0x267   : > { %1052 = vmatprep.mubr.f32.mxu1 %v2428_v3 }
 0x26a   : > { %1993 = vmatmul.mubr.msk.f32.gmra.mrb[10].mxu1 %vm530_vm1, %v2681_v5 }
 0x26b   : > { %1058 = vmatprep.mubr.f32.mxu1 %v2428_v3 }
 0x26e   : > { %1994 = vmatmul.mubr.msk.f32.gmra.mrb[12].mxu1 %vm530_vm1, %v2706_v10 }
 0x26f   : > { %1626 = vmatprep.mubr.f32.mxu1 %v2428_v3 }
 0x335   : > { %v1042_v1 = vpop.f32.mrb[6].mxu1 }
 0x336   : > { %v2918_v4 = vadd.f32 %v1042_v1, %v2720_v15  ;;  %v1044_v52 = vpop.f32.mrb[7].mxu1 }
 0x337   : > { %v2921_v53 = vadd.f32 %v1044_v52, %v2720_v15 }
 0x338   : > { %v1065_v9 = vmul.f32 %v2918_v4, %v2918_v4 }
 0x339   : > { %v1066_v5 = vmul.f32 %v2921_v53, %v2921_v53  ;;  %v1048_v54 = vpop.f32.mrb[8].mxu1 }
 0x33a   : > { %v1073_v55 = vmul.f32 %v1065_v9, %v2918_v4  ;;  %v2929_v10 = vadd.f32 %v1048_v54, %v2736_v25  ;;  %v1050_v56 = vpop.f32.mrb[9].mxu1 }
 0x33b   : > { %v1074_v57 = vmul.f32 %v1066_v5, %v2921_v53  ;;  %v2933_v58 = vadd.f32 %v1050_v56, %v2736_v25 }
 0x33c   : > { %v1081_v59 = vmul.f32 0.044715, %v1073_v55  ;;  %v1067_v60 = vmul.f32 %v2929_v10, %v2929_v10 }
 0x33d   : > { %v1082_v63 = vmul.f32 0.044715, %v1074_v57  ;;  %v1068_v0 = vmul.f32 %v2933_v58, %v2933_v58  ;;  %v1054_v2 = vpop.f32.mrb[10].mxu1 }
 0x33e   : > { %v1089_v6 = vadd.f32 %v1081_v59, %v2918_v4  ;;  %v1075_v7 = vmul.f32 %v1067_v60, %v2929_v10  ;;  %v2942_v8 = vadd.f32 %v1054_v2, %v2718_v14  ;;  %v1056_v11 = vpop.f32.mrb[11].mxu1 }
 0x33f   : > { %v1090_v12 = vadd.f32 %v1082_v63, %v2921_v53  ;;  %v1076_v13 = vmul.f32 %v1068_v0, %v2933_v58  ;;  %v2947_v16 = vadd.f32 %v1056_v11, %v2718_v14 }
 0x340   : > { %v1097_v21 = vmul.f32 0.7978846, %v1089_v6  ;;  %v1083_v26 = vmul.f32 0.044715, %v1075_v7  ;;  %v1069_v27 = vmul.f32 %v2942_v8, %v2942_v8 }
 0x341   : > { %v1098_v33 = vmul.f32 0.7978846, %v1090_v12  ;;  %v1084_v28 = vmul.f32 0.044715, %v1076_v13  ;;  %v1070_v18 = vmul.f32 %v2947_v16, %v2947_v16  ;;  %v1060_v34 = vpop.f32.mrb[12].mxu1 }
 0x342   : > { %2188 = vtanh.f32 %v1097_v21  ;;  %v1091_v37 = vadd.f32 %v1083_v26, %v2929_v10  ;;  %v1077_v19 = vmul.f32 %v1069_v27, %v2942_v8  ;;  %v2956_v35 = vadd.f32 %v1060_v34, %v2734_v24  ;;  %v1062_v22 = vpop.f32.mrb[13].mxu1 }
 0x343   : > { %2190 = vtanh.f32 %v1098_v33  ;;  %v1092_v23 = vadd.f32 %v1084_v28, %v2933_v58  ;;  %v1078_v31 = vmul.f32 %v1070_v18, %v2947_v16  ;;  %v2961_v17 = vadd.f32 %v1062_v22, %v2734_v24 }
 0x344   : > { %v1099_v32 = vmul.f32 0.7978846, %v1091_v37  ;;  %v1085_v36 = vmul.f32 0.044715, %v1077_v19  ;;  %v1071_v61 = vmul.f32 %v2956_v35, %v2956_v35 }
 0x345   : > { %v1100_v20 = vmul.f32 0.7978846, %v1092_v23  ;;  %v1086_v38 = vmul.f32 0.044715, %v1078_v31  ;;  %v1072_v43 = vmul.f32 %v2961_v17, %v2961_v17 }
 0x346   : > { %2192 = vtanh.f32 %v1099_v32  ;;  %v1093_v44 = vadd.f32 %v1085_v36, %v2942_v8  ;;  %v1079_v62 = vmul.f32 %v1071_v61, %v2956_v35 }
 0x347   : > { %2194 = vtanh.f32 %v1100_v20  ;;  %v1094_v45 = vadd.f32 %v1086_v38, %v2947_v16  ;;  %v1080_v46 = vmul.f32 %v1072_v43, %v2961_v17 }
 0x348   : > { %v1101_v47 = vmul.f32 0.7978846, %v1093_v44  ;;  %v1087_v48 = vmul.f32 0.044715, %v1079_v62  ;;  %v1220_v44 = vstv %s1219_s20  ;;  %s1641_s20 = smul.u32 73244475, %s1640_s8 }
 0x349   : > { %v1102_v49 = vmul.f32 0.7978846, %v1094_v45  ;;  %v1088_v51 = vmul.f32 0.044715, %v1080_v46  ;;  %v1221_v62 = vxor.u32 %v1220_v44, %v2799_v40  ;;  %v1222_v45 = vxor.u32 %v1220_v44, %v2801_v30 }
 0x34a   : > { %2196 = vtanh.f32 %v1101_v47  ;;  %v1095_v1 = vadd.f32 %v1087_v48, %v2956_v35  ;;  %s1642_s25 = sshra.s32 %s1641_s20, 16 }
 0x34b   : > { %2198 = vtanh.f32 %v1102_v49  ;;  %v1096_v52 = vadd.f32 %v1088_v51, %v2961_v17  ;;  %v1996_v46 = vshrl.u32 %v1221_v62, 16  ;;  %s1643_s22 = sand.u32 65535, %s1642_s25 }
 0x34c   : > { %v2189_v9 = vpop.eup %2188  ;;  %v1103_v5 = vmul.f32 0.7978846, %v1095_v1  ;;  %s1644_s10 = sxor.u32 %s1643_s22, %s1641_s20 }
 0x34d   : > { %v2191_v54 = vpop.eup %2190  ;;  %v1113_v55 = vadd.f32 1.0, %v2189_v9  ;;  %v1104_v56 = vmul.f32 0.7978846, %v1096_v52  ;;  %v1227_v47 = vxor.u32 %v1996_v46, %v1221_v62 }
 0x34e   : > { %2200 = vtanh.f32 %v1103_v5  ;;  %v1114_v57 = vadd.f32 1.0, %v2191_v54 }
 0x34f   : > { %2202 = vtanh.f32 %v1104_v56  ;;  %v1121_v63 = vmul.f32 0.5, %v1113_v55 }
 0x350   : > { %v2193_v59 = vpop.eup %2192  ;;  %v1122_v6 = vmul.f32 0.5, %v1114_v57 }
 0x351   : > { %v2195_v60 = vpop.eup %2194  ;;  %v1115_v0 = vadd.f32 1.0, %v2193_v59  ;;  %v1129_v21 = vmul.f32 %v1121_v63, %v2918_v4 }
 0x352   : > { %v1116_v2 = vadd.f32 1.0, %v2195_v60  ;;  %v1130_v33 = vmul.f32 %v1122_v6, %v2921_v53 }
 0x353   : > { %v1123_v7 = vmul.f32 0.5, %v1115_v0 }
 0x354   : > { %v2197_v11 = vpop.eup %2196  ;;  %v1124_v12 = vmul.f32 0.5, %v1116_v2 }
 0x355   : > { %v2199_v13 = vpop.eup %2198  ;;  %v1131_v26 = vmul.f32 %v1123_v7, %v2929_v10  ;;  %v1117_v27 = vadd.f32 1.0, %v2197_v11 }
 0x356   : > { %v1132_v28 = vmul.f32 %v1124_v12, %v2933_v58  ;;  %v1118_v18 = vadd.f32 1.0, %v2199_v13 }
 0x357   : > { %v2036_v34 = vpack.c.bf16 %v1131_v26, %v1129_v21  ;;  %v1125_v23 = vmul.f32 0.5, %v1117_v27 }
 0x358   : > { %v2201_v37 = vpop.eup %2200  ;;  %v2034_v19 = vpack.c.bf16 %v1132_v28, %v1130_v33  ;;  %v1126_v32 = vmul.f32 0.5, %v1118_v18 }
 0x359   : > { %v2203_v22 = vpop.eup %2202  ;;  %v1119_v31 = vadd.f32 1.0, %v2201_v37  ;;  %v1133_v58 = vmul.f32 %v1125_v23, %v2942_v8  ;;  %v1997_v8 = vshrl.u32 %v1222_v45, 16 }
 0x35a   : > { %2035 = vmatprep.subr.bf16.mxu0 %v2034_v19  ;;  %v1120_v4 = vadd.f32 1.0, %v2203_v22  ;;  %v1134_v61 = vmul.f32 %v1126_v32, %v2947_v16  ;;  %v1229_v16 = vmul.u32 73244475, %v1227_v47 }
 0x35b   : > { %v1127_v10 = vmul.f32 0.5, %v1119_v31  ;;  %2037 = vmatpush1.bf16.msra.mxu0 %v2036_v34 }
 0x35c   : > { %v1128_v53 = vmul.f32 0.5, %v1120_v4  ;;  %v1998_v48 = vshrl.u32 %v1229_v16, 16 }
 0x35d   : > { %v1135_v36 = vmul.f32 %v1127_v10, %v2956_v35  ;;  %v1228_v35 = vxor.u32 %v1997_v8, %v1222_v45 }
 0x35e   : > { %v1136_v20 = vmul.f32 %v1128_v53, %v2961_v17  ;;  %v1235_v51 = vxor.u32 %v1998_v48, %v1229_v16 }
 0x35f   : > { %v2040_v38 = vpack.c.bf16 %v1135_v36, %v1133_v58  ;;  %v1230_v17 = vmul.u32 73244475, %v1228_v35 }
 0x360   : > { %v2038_v43 = vpack.c.bf16 %v1136_v20, %v1134_v61  ;;  %v1237_v52 = vmul.u32 73244475, %v1235_v51 }
 0x361   : > { %v1999_v49 = vshrl.u32 %v1230_v17, 16 }
 0x362   : > { %2039 = vmatprep.subr.bf16.mxu0 %v2038_v43  ;;  %v2000_v5 = vshrl.u32 %v1237_v52, 16 }
 0x363   : > { %2041 = vmatpush1.bf16.msra.mxu0 %v2040_v38  ;;  %v1236_v1 = vxor.u32 %v1999_v49, %v1230_v17 }
 0x364   : > { %v1243_v55 = vxor.u32 %v2000_v5, %v1237_v52 }
 0x365   : > { %v1238_v9 = vmul.u32 73244475, %v1236_v1 }
 0x366   : > { %1995 = vmatmul.mubr.msk.f32.vlgmr.msra.gmra.mrb[4].mxu0 %vm709_vm2, %v2806_v41  ;;  %v1245_v57 = vand.u32 2147483647, %v1243_v55 }
 0x367   : > { %1465 = vmatprep.mubr.f32.mxu0 %v2428_v3  ;;  %v2001_v54 = vshrl.u32 %v1238_v9, 16 }
 0x368   : > { %v1247_v60 = vshra.s32 %v1245_v57, 8 }
 0x369   : > { %v1244_v56 = vxor.u32 %v2001_v54, %v1238_v9 }
 0x36a   : > { %v1249_v0 = vcvt.s32.f32 %v1247_v60 }
 0x36b   : > { %v1246_v59 = vand.u32 2147483647, %v1244_v56 }
 0x36c   : > { %v1251_v2 = vadd.f32 0.5, %v1249_v0 }
 0x36d   : > { %v1248_v63 = vshra.s32 %v1246_v59, 8 }
 0x36e   : > { %v2987_v7 = vmul.f32 1.1920929e-07, %v1251_v2 }
 0x36f   : > { %v1250_v41 = vcvt.s32.f32 %v1248_v63 }
 0x370   : > { %v1305_v12 = vsub.f32 1.0, %v2987_v7  ;;  %v2996_v22 = vadd.f32 -0.5, %v2987_v7  ;;  %vm1369_vm15 = vcmp.lt.f32.partialorder %v2987_v7, 0.5 }
 0x371   : > { %v1252_v6 = vadd.f32 0.5, %v1250_v41 }
 0x372   : > { %v1307_v21 = vmin.f32 %v2987_v7, %v1305_v12  ;;  %v3003_v32 = vmul.f32 %v2996_v22, %v2996_v22 }
 0x373   : > { %v2989_v11 = vmul.f32 1.1920929e-07, %v1252_v6 }
 0x374   : > { %2204 = vlog2.f32 %v1307_v21  ;;  %v1281_v61 = vmul.f32 -54.476097, %v3003_v32  ;;  %v1259_v56 = vmul.f32 -39.69683, %v3003_v32 }
 0x375   : > { %v1306_v13 = vsub.f32 1.0, %v2989_v11  ;;  %v2999_v23 = vadd.f32 -0.5, %v2989_v11  ;;  %vm1370_vm4 = vcmp.lt.f32.partialorder %v2989_v11, 0.5 }
 0x376   : > { %v1283_v45 = vadd.f32 161.58583, %v1281_v61  ;;  %v1261_v2 = vadd.f32 220.9461, %v1259_v56 }
 0x377   : > { %v1308_v26 = vmin.f32 %v2989_v11, %v1306_v13  ;;  %v3007_v10 = vmul.f32 %v2999_v23, %v2999_v23 }
 0x378   : > { %v1285_v35 = vmul.f32 %v1283_v45, %v3003_v32 }
 0x379   : > { %2206 = vlog2.f32 %v1308_v26  ;;  %v1282_v20 = vmul.f32 -54.476097, %v3007_v10  ;;  %v1260_v57 = vmul.f32 -39.69683, %v3007_v10 }
 0x37a   : > { %v1287_v49 = vadd.f32 -155.69897, %v1285_v35 }
 0x37b   : > { %v1284_v46 = vadd.f32 161.58583, %v1282_v20  ;;  %v1262_v6 = vadd.f32 220.9461, %v1260_v57 }
 0x37c   : > { %v1289_v9 = vmul.f32 %v1287_v49, %v3003_v32 }
 0x37d   : > { %v1286_v16 = vmul.f32 %v1284_v46, %v3007_v10 }
 0x37e   : > { %v2205_v27 = vpop.eup %2204  ;;  %v1291_v63 = vadd.f32 66.801315, %v1289_v9 }
 0x37f   : > { %v1310_v28 = vmul.f32 0.6931472, %v2205_v27  ;;  %v1288_v51 = vadd.f32 -155.69897, %v1286_v16 }
 0x380   : > { %v1293_v13 = vmul.f32 %v1291_v63, %v3003_v32 }
 0x381   : > { %v1313_v34 = vmul.f32 -2.0, %v1310_v28  ;;  %v1290_v5 = vmul.f32 %v1288_v51, %v3007_v10  ;;  %v1264_v28 = vmul.f32 %v1262_v6, %v3007_v10 }
 0x383   : > { %v2207_v33 = vpop.eup %2206  ;;  %2208 = vrsqrt.f32 %v1313_v34  ;;  %vm1317_vm11 = vcmp.eq.f32.partialorder %v1313_v34, inf  ;;  %v1320_v53 = vand.u32 2147483648, %v1313_v34  ;;  %vm1319_vm12 = vcmp.eq.f32.partialorder %v1313_v34, 0.0 }
 0x384   : > { %v1312_v18 = vmul.f32 0.6931472, %v2207_v33  ;;  %v1292_v0 = vadd.f32 66.801315, %v1290_v5  ;;  %v1263_v33 = vmul.f32 %v1261_v2, %v3003_v32 }
 0x386   : > { %v1314_v37 = vmul.f32 -2.0, %v1312_v18  ;;  %v1294_v21 = vmul.f32 %v1292_v0, %v3007_v10 }
 0x388   : > { %2210 = vrsqrt.f32 %v1314_v37  ;;  %vm1324_vm13 = vcmp.eq.f32.partialorder %v1314_v37, inf  ;;  %vm1326_vm14 = vcmp.eq.f32.partialorder %v1314_v37, 0.0  ;;  %v1327_v44 = vand.u32 2147483648, %v1314_v37 }
 0x38d   : > { %v2209_v19 = vpop.eup %2208 }
 0x38e   : > { %v1316_v4 = vmul.f32 %v2209_v19, %v1313_v34  ;;  %v1296_v19 = vadd.f32 -13.280682, %v1294_v21 }
 0x390   : > { %v1318_v58 = vsel %vm1317_vm11, %v1313_v34, %v1316_v4 }
 0x391   : > { %v3011_v38 = vsel %vm1319_vm12, %v1320_v53, %v1318_v58  ;;  %v1265_v53 = vadd.f32 -275.9285, %v1263_v33  ;;  %v1266_v58 = vadd.f32 -275.9285, %v1264_v28 }
 0x392   : > { %v2211_v31 = vpop.eup %2210  ;;  %v1349_v62 = vmul.f32 0.007784696, %v3011_v38  ;;  %v1329_v54 = vmul.f32 -0.007784894, %v3011_v38 }
 0x393   : > { %v1323_v36 = vmul.f32 %v2211_v31, %v1314_v37  ;;  %v1267_v45 = vmul.f32 %v1265_v53, %v3003_v32  ;;  %v1268_v46 = vmul.f32 %v1266_v58, %v3007_v10 }
 0x394   : > { %v1351_v47 = vadd.f32 0.32246712, %v1349_v62  ;;  %v1331_v41 = vadd.f32 -0.32239646, %v1329_v54 }
 0x395   : > { %v1325_v43 = vsel %vm1324_vm13, %v1314_v37, %v1323_v36  ;;  %v1295_v37 = vadd.f32 -13.280682, %v1293_v13  ;;  %v1269_v51 = vadd.f32 138.35776, %v1267_v45 }
 0x396   : > { %v3014_v8 = vsel %vm1326_vm14, %v1327_v44, %v1325_v43  ;;  %v1353_v48 = vmul.f32 %v1351_v47, %v3011_v38  ;;  %v1333_v26 = vmul.f32 %v1331_v41, %v3011_v38  ;;  %v1298_v43 = vmul.f32 %v1296_v19, %v3007_v10 }
 0x397   : > { %v1350_v17 = vmul.f32 0.007784696, %v3014_v8  ;;  %v1330_v55 = vmul.f32 -0.007784894, %v3014_v8  ;;  %v1297_v20 = vmul.f32 %v1295_v37, %v3003_v32  ;;  %v1271_v54 = vmul.f32 %v1269_v51, %v3003_v32  ;;  %v2255_v51 = vld [vmem:[%s3303_s5 + $0x18] sm:$0xff] }
 0x398   : > { %v1355_v52 = vadd.f32 2.4451342, %v1353_v48  ;;  %v1335_v31 = vadd.f32 -2.4007583, %v1333_v26  ;;  %v1375_v37 = vand.u32 2147483647, %v2996_v22 }
 0x399   : > { %v1352_v1 = vadd.f32 0.32246712, %v1350_v17  ;;  %v1332_v12 = vadd.f32 -0.32239646, %v1330_v55  ;;  %v1299_v16 = vadd.f32 1.0, %v1297_v20  ;;  %v1300_v17 = vadd.f32 1.0, %v1298_v43 }
 0x39a   : > { %v1357_v60 = vmul.f32 %v1355_v52, %v3011_v38  ;;  %v1337_v44 = vmul.f32 %v1335_v31, %v3011_v38  ;;  %vm1377_vm3 = vcmp.le.f32.partialorder %v1375_v37, 0.47575 }
 0x39b   : > { %v1354_v59 = vmul.f32 %v1352_v1, %v3014_v8  ;;  %v1334_v18 = vmul.f32 %v1332_v12, %v3014_v8  ;;  %v1270_v1 = vadd.f32 138.35776, %v1268_v46 }
 0x39c   : > { %v1359_v34 = vadd.f32 3.7544086, %v1357_v60  ;;  %v1339_v48 = vadd.f32 -2.5497324, %v1337_v44 }
 0x39d   : > { %v1356_v27 = vadd.f32 2.4451342, %v1354_v59  ;;  %v1336_v36 = vadd.f32 -2.4007583, %v1334_v18  ;;  %v1272_v55 = vmul.f32 %v1270_v1, %v3007_v10  ;;  %v1273_v59 = vadd.f32 -30.664799, %v1271_v54 }
 0x39e   : > { %v1361_v61 = vmul.f32 %v1359_v34, %v3011_v38  ;;  %v1341_v9 = vmul.f32 %v1339_v48, %v3011_v38  ;;  %v2252_v48 = vld [vmem:[%s3303_s5] sm:$0xff] }
 0x39f   : > { %v1358_v4 = vmul.f32 %v1356_v27, %v3014_v8  ;;  %v1338_v47 = vmul.f32 %v1336_v36, %v3014_v8  ;;  %v1274_v60 = vadd.f32 -30.664799, %v1272_v55  ;;  %v1275_v41 = vmul.f32 %v1273_v59, %v3003_v32 }
 0x3a0   : > { %v1363_v35 = vadd.f32 1.0, %v1361_v61  ;;  %v1343_v57 = vadd.f32 4.3746643, %v1341_v9  ;;  %v1376_v32 = vand.u32 2147483647, %v2999_v23 }
 0x3a1   : > { %v1360_v62 = vadd.f32 3.7544086, %v1358_v4  ;;  %v1340_v52 = vadd.f32 -2.5497324, %v1338_v47  ;;  %v1276_v2 = vmul.f32 %v1274_v60, %v3007_v10  ;;  %v1277_v13 = vadd.f32 2.5066283, %v1275_v41 }
 0x3a2   : > { %2212 = vrcp.f32 %v1363_v35  ;;  %v1345_v0 = vmul.f32 %v1343_v57, %v3011_v38  ;;  %vm1378_vm5 = vcmp.le.f32.partialorder %v1376_v32, 0.47575 }
 0x3a3   : > { %v1362_v49 = vmul.f32 %v1360_v62, %v3014_v8  ;;  %2214 = vrcp.f32 %v1299_v16  ;;  %v1342_v56 = vmul.f32 %v1340_v52, %v3014_v8  ;;  %v1278_v21 = vadd.f32 2.5066283, %v1276_v2 }
 0x3a4   : > { %2216 = vrcp.f32 %v1300_v17  ;;  %v1347_v12 = vadd.f32 2.938164, %v1345_v0  ;;  %v1279_v27 = vmul.f32 %v2996_v22, %v1277_v13 }
 0x3a5   : > { %v1364_v5 = vadd.f32 1.0, %v1362_v49  ;;  %v1344_v63 = vadd.f32 4.3746643, %v1342_v56  ;;  %v1280_v18 = vmul.f32 %v2999_v23, %v1278_v21  ;;  %v2254_v49 = vld [vmem:[%s3303_s5 + $0x10] sm:$0xff] }
 0x3a7   : > { %2218 = vrcp.f32 %v1364_v5  ;;  %v1346_v6 = vmul.f32 %v1344_v63, %v3014_v8 }
 0x3a9   : > { %v1348_v33 = vadd.f32 2.938164, %v1346_v6 }
 0x3ac   : > { %v2213_v26 = vpop.eup %2212 }
 0x3ad   : > { %v2215_v28 = vpop.eup %2214  ;;  %v1366_v34 = vmul.f32 %v2213_v26, %v1347_v12 }
 0x3ae   : > { %v2217_v38 = vpop.eup %2216  ;;  %v1302_v19 = vmul.f32 %v2215_v28, %v1279_v27 }
 0x3af   : > { %v1371_v8 = vsub.f32 0.0, %v1366_v34  ;;  %v1304_v4 = vmul.f32 %v2217_v38, %v1280_v18 }
 0x3b1   : > { %v2219_v10 = vpop.eup %2218  ;;  %v1373_v53 = vsel %vm1369_vm15, %v1366_v34, %v1371_v8 }
 0x3b2   : > { %v1368_v31 = vmul.f32 %v2219_v10, %v1348_v33  ;;  %v1379_v36 = vsel %vm1377_vm3, %v1302_v19, %v1373_v53 }
 0x3b3   : > { %v1388_v22 = vmul.f32 %v1379_v36, %v2883_v29 }
 0x3b4   : > { %v1372_v58 = vsub.f32 0.0, %v1368_v31 }
 0x3b6   : > { %v1374_v61 = vsel %vm1370_vm4, %v1368_v31, %v1372_v58 }
 0x3b7   : > { %v1380_v20 = vsel %vm1378_vm5, %v1304_v4, %v1374_v61 }
 0x3b8   : > { %v1389_v43 = vmul.f32 %v1380_v20, %v2883_v29 }
 0x3ba   : > { %v1392_v7 = vcombine.low %v1388_v22, %v1389_v43 }
 0x439   : > { %v1203_v44 = vpop.f32.mrb[4].mxu0 }
 0x43a   : > { %v1204_v23 = vadd.f32 %v1203_v44, %v2889_v39  ;;  %v1205_v62 = vpop.f32.mrb[5].mxu0 }
 0x43b   : > { %v1206_v45 = vadd.f32 %v1205_v62, %v2889_v39 }
 0x43c   : > { %v1381_v46 = vmul.f32 %v1204_v23, %v2891_v42 }
 0x43d   : > { %v1382_v11 = vmul.f32 %v1206_v45, %v2891_v42 }
 0x43f   : > { %v1385_v47 = vcombine.low %v1381_v46, %v1382_v11 }
 0x441   : > { %v1387_v35 = vadd.f32 %v1385_v47, %v2898_v50  ;;  %v2253_v50 = vld [vmem:[%s3303_s5 + $0x8] sm:$0xff] }
 0x443   : > { %v3064_v16 = vadd.f32 %v1392_v7, %v1387_v35 }
 0x445   : > { %v1396_v17 = vcombine.high %v3064_v16, %v3064_v16 }
 0x447   : > { %2004 = vmatprep.subr.msk.mxu0 %vm543_vm0, %v1396_v17 }
 0x448   : > { %2005 = vmatpush1.msk.msra.mxu0 %vm543_vm0, %v3064_v16 }
 0x449   : > { %2006 = vmatmul.mubr.msk.f32.vlgmr.msra.gmra.mrb[6].mxu0 %vm530_vm1, %v2252_v48 }
 0x44a   : > { %1471 = vmatprep.mubr.f32.mxu0 %v2428_v3 }
 0x44d   : > { %2007 = vmatmul.mubr.msk.f32.gmra.mrb[8].mxu0 %vm530_vm1, %v2253_v50 }
 0x44e   : > { %1477 = vmatprep.mubr.f32.mxu0 %v2428_v3 }
 0x451   : > { %2008 = vmatmul.mubr.msk.f32.gmra.mrb[10].mxu0 %vm530_vm1, %v2254_v49 }
 0x452   : > { %1483 = vmatprep.mubr.f32.mxu0 %v2428_v3 }
 0x455   : > { %2009 = vmatmul.mubr.msk.f32.gmra.mrb[12].mxu0 %vm530_vm1, %v2255_v51 }
 0x51c   : > { %v1467_v1 = vpop.f32.mrb[6].mxu0 }
 0x51d   : > { %v3091_v52 = vadd.f32 %v1467_v1, %v2720_v15  ;;  %v1469_v9 = vpop.f32.mrb[7].mxu0 }
 0x51e   : > { %v3094_v5 = vadd.f32 %v1469_v9, %v2720_v15 }
 0x51f   : > { %v1490_v54 = vmul.f32 %v3091_v52, %v3091_v52 }
 0x520   : > { %v1491_v3 = vmul.f32 %v3094_v5, %v3094_v5  ;;  %v1473_v55 = vpop.f32.mrb[8].mxu0 }
 0x521   : > { %v1498_v56 = vmul.f32 %v1490_v54, %v3091_v52  ;;  %v3102_v57 = vadd.f32 %v1473_v55, %v2736_v25  ;;  %v1475_v59 = vpop.f32.mrb[9].mxu0 }
 0x522   : > { %v1499_v60 = vmul.f32 %v1491_v3, %v3094_v5  ;;  %v3106_v63 = vadd.f32 %v1475_v59, %v2736_v25 }
 0x523   : > { %v1506_v15 = vmul.f32 0.044715, %v1498_v56  ;;  %v1492_v0 = vmul.f32 %v3102_v57, %v3102_v57 }
 0x524   : > { %v1507_v41 = vmul.f32 0.044715, %v1499_v60  ;;  %v1493_v2 = vmul.f32 %v3106_v63, %v3106_v63  ;;  %v1479_v6 = vpop.f32.mrb[10].mxu0 }
 0x525   : > { %v1514_v12 = vadd.f32 %v1506_v15, %v3091_v52  ;;  %v1500_v13 = vmul.f32 %v1492_v0, %v3102_v57  ;;  %v3115_v21 = vadd.f32 %v1479_v6, %v2718_v14  ;;  %v1481_v26 = vpop.f32.mrb[11].mxu0 }
 0x526   : > { %v1515_v25 = vadd.f32 %v1507_v41, %v3094_v5  ;;  %v1501_v27 = vmul.f32 %v1493_v2, %v3106_v63  ;;  %v3120_v33 = vadd.f32 %v1481_v26, %v2718_v14 }
 0x527   : > { %v1522_v28 = vmul.f32 0.7978846, %v1514_v12  ;;  %v1508_v18 = vmul.f32 0.044715, %v1500_v13  ;;  %v1494_v34 = vmul.f32 %v3115_v21, %v3115_v21 }
 0x528   : > { %v1523_v37 = vmul.f32 0.7978846, %v1515_v25  ;;  %v1509_v38 = vmul.f32 0.044715, %v1501_v27  ;;  %v1495_v19 = vmul.f32 %v3120_v33, %v3120_v33  ;;  %v1485_v32 = vpop.f32.mrb[12].mxu0 }
 0x529   : > { %2220 = vtanh.f32 %v1522_v28  ;;  %v1516_v10 = vadd.f32 %v1508_v18, %v3102_v57  ;;  %v1502_v8 = vmul.f32 %v1494_v34, %v3115_v21  ;;  %v3129_v31 = vadd.f32 %v1485_v32, %v2734_v24  ;;  %v1487_v14 = vpop.f32.mrb[13].mxu0 }
 0x52a   : > { %2222 = vtanh.f32 %v1523_v37  ;;  %v1517_v4 = vadd.f32 %v1509_v38, %v3106_v63  ;;  %v1503_v53 = vmul.f32 %v1495_v19, %v3120_v33  ;;  %v3134_v58 = vadd.f32 %v1487_v14, %v2734_v24 }
 0x52b   : > { %v1524_v36 = vmul.f32 0.7978846, %v1516_v10  ;;  %v1510_v61 = vmul.f32 0.044715, %v1502_v8  ;;  %v1496_v22 = vmul.f32 %v3129_v31, %v3129_v31 }
 0x52c   : > { %v1525_v20 = vmul.f32 0.7978846, %v1517_v4  ;;  %v1511_v43 = vmul.f32 0.044715, %v1503_v53  ;;  %v1497_v7 = vmul.f32 %v3134_v58, %v3134_v58 }
 0x52d   : > { %2224 = vtanh.f32 %v1524_v36  ;;  %v1518_v44 = vadd.f32 %v1510_v61, %v3115_v21  ;;  %v1504_v23 = vmul.f32 %v1496_v22, %v3129_v31  ;;  %v1645_v36 = vstv %s1644_s10 }
 0x52e   : > { %2226 = vtanh.f32 %v1525_v20  ;;  %v1519_v62 = vadd.f32 %v1511_v43, %v3120_v33  ;;  %v1505_v24 = vmul.f32 %v1497_v7, %v3134_v58  ;;  %v1646_v61 = vxor.u32 %v1645_v36, %v2799_v40 }
 0x52f   : > { %v1526_v45 = vmul.f32 0.7978846, %v1518_v44  ;;  %v1512_v46 = vmul.f32 0.044715, %v1504_v23  ;;  %v1647_v22 = vxor.u32 %v1645_v36, %v2801_v30 }
 0x530   : > { %v1527_v11 = vmul.f32 0.7978846, %v1519_v62  ;;  %v1513_v47 = vmul.f32 0.044715, %v1505_v24  ;;  %v2011_v20 = vshrl.u32 %v1646_v61, 16 }
 0x531   : > { %2228 = vtanh.f32 %v1526_v45  ;;  %v1520_v35 = vadd.f32 %v1512_v46, %v3129_v31 }
 0x532   : > { %2230 = vtanh.f32 %v1527_v11  ;;  %v1521_v17 = vadd.f32 %v1513_v47, %v3134_v58  ;;  %v1652_v43 = vxor.u32 %v2011_v20, %v1646_v61 }
 0x533   : > { %v2221_v48 = vpop.eup %2220  ;;  %v1528_v50 = vmul.f32 0.7978846, %v1520_v35 }
 0x534   : > { %v2223_v49 = vpop.eup %2222  ;;  %v1538_v51 = vadd.f32 1.0, %v2221_v48  ;;  %v1529_v1 = vmul.f32 0.7978846, %v1521_v17 }
 0x535   : > { %2232 = vtanh.f32 %v1528_v50  ;;  %v1539_v9 = vadd.f32 1.0, %v2223_v49 }
 0x536   : > { %2234 = vtanh.f32 %v1529_v1  ;;  %v1546_v55 = vmul.f32 0.5, %v1538_v51 }
 0x537   : > { %v2225_v54 = vpop.eup %2224  ;;  %v1547_v60 = vmul.f32 0.5, %v1539_v9 }
 0x538   : > { %v2227_v3 = vpop.eup %2226  ;;  %v1540_v56 = vadd.f32 1.0, %v2225_v54  ;;  %v1554_v6 = vmul.f32 %v1546_v55, %v3091_v52 }
 0x539   : > { %v1541_v59 = vadd.f32 1.0, %v2227_v3  ;;  %v1555_v26 = vmul.f32 %v1547_v60, %v3094_v5 }
 0x53a   : > { %v1548_v15 = vmul.f32 0.5, %v1540_v56 }
 0x53b   : > { %v2229_v0 = vpop.eup %2228  ;;  %v1549_v41 = vmul.f32 0.5, %v1541_v59 }
 0x53c   : > { %v2231_v2 = vpop.eup %2230  ;;  %v1556_v12 = vmul.f32 %v1548_v15, %v3102_v57  ;;  %v1542_v13 = vadd.f32 1.0, %v2229_v0 }
 0x53d   : > { %v1557_v25 = vmul.f32 %v1549_v41, %v3106_v63  ;;  %v1543_v27 = vadd.f32 1.0, %v2231_v2 }
 0x53e   : > { %v2044_v28 = vpack.c.bf16 %v1556_v12, %v1554_v6  ;;  %v1550_v38 = vmul.f32 0.5, %v1542_v13 }
 0x53f   : > { %v2233_v18 = vpop.eup %2232  ;;  %v2042_v34 = vpack.c.bf16 %v1557_v25, %v1555_v26  ;;  %v1551_v32 = vmul.f32 0.5, %v1543_v27 }
 0x540   : > { %v2235_v37 = vpop.eup %2234  ;;  %v1544_v19 = vadd.f32 1.0, %v2233_v18  ;;  %v1558_v63 = vmul.f32 %v1550_v38, %v3115_v21  ;;  %v2012_v21 = vshrl.u32 %v1647_v22, 16 }
 0x541   : > { %2043 = vmatprep.subr.bf16.mxu1 %v2042_v34  ;;  %v1545_v52 = vadd.f32 1.0, %v2235_v37  ;;  %v1559_v8 = vmul.f32 %v1551_v32, %v3120_v33  ;;  %v2256_v33 = vld [vmem:[%s3304_s6] sm:$0xf] }
 0x542   : > { %v1552_v57 = vmul.f32 0.5, %v1544_v19  ;;  %2045 = vmatpush1.bf16.msra.mxu1 %v2044_v28 }
 0x543   : > { %v1553_v5 = vmul.f32 0.5, %v1545_v52 }
 0x544   : > { %v1560_v10 = vmul.f32 %v1552_v57, %v3129_v31  ;;  %v1653_v31 = vxor.u32 %v2012_v21, %v1647_v22 }
 0x545   : > { %v1561_v14 = vmul.f32 %v1553_v5, %v3134_v58  ;;  %v1654_v58 = vmul.u32 73244475, %v1652_v43 }
 0x546   : > { %v2048_v4 = vpack.c.bf16 %v1560_v10, %v1558_v63  ;;  %v1655_v7 = vmul.u32 73244475, %v1653_v31 }
 0x547   : > { %v2046_v53 = vpack.c.bf16 %v1561_v14, %v1559_v8  ;;  %v2013_v44 = vshrl.u32 %v1654_v58, 16 }
 0x548   : > { %v2014_v23 = vshrl.u32 %v1655_v7, 16 }
 0x549   : > { %2047 = vmatprep.subr.bf16.mxu1 %v2046_v53  ;;  %v1660_v62 = vxor.u32 %v2013_v44, %v1654_v58 }
 0x54a   : > { %2049 = vmatpush1.bf16.msra.mxu1 %v2048_v4  ;;  %v1661_v40 = vxor.u32 %v2014_v23, %v1655_v7 }
 0x54b   : > { %v1662_v24 = vmul.u32 73244475, %v1660_v62 }
 0x54c   : > { %v1663_v30 = vmul.u32 73244475, %v1661_v40 }
 0x54d   : > { %2010 = vmatmul.mubr.msk.f32.vlgmr.msra.gmra.mrb[14].mxu1 %vm709_vm2, %v2256_v33  ;;  %v2015_v45 = vshrl.u32 %v1662_v24, 16 }
 0x54e   : > { %v2016_v46 = vshrl.u32 %v1663_v30, 16 }
 0x54f   : > { %v1668_v11 = vxor.u32 %v2015_v45, %v1662_v24 }
 0x550   : > { %v1669_v47 = vxor.u32 %v2016_v46, %v1663_v30 }
 0x551   : > { %v1670_v35 = vand.u32 2147483647, %v1668_v11 }
 0x552   : > { %v1671_v17 = vand.u32 2147483647, %v1669_v47 }
 0x553   : > { %v1672_v48 = vshra.s32 %v1670_v35, 8 }
 0x554   : > { %v1673_v50 = vshra.s32 %v1671_v17, 8 }
 0x555   : > { %v1674_v49 = vcvt.s32.f32 %v1672_v48 }
 0x556   : > { %v1675_v51 = vcvt.s32.f32 %v1673_v50 }
 0x557   : > { %v1676_v1 = vadd.f32 0.5, %v1674_v49 }
 0x558   : > { %v1677_v9 = vadd.f32 0.5, %v1675_v51 }
 0x559   : > { %v3161_v54 = vmul.f32 1.1920929e-07, %v1676_v1 }
 0x55a   : > { %v3163_v3 = vmul.f32 1.1920929e-07, %v1677_v9 }
 0x55b   : > { %v1730_v55 = vsub.f32 1.0, %v3161_v54  ;;  %v3170_v26 = vadd.f32 -0.5, %v3161_v54  ;;  %vm1794_vm7 = vcmp.lt.f32.partialorder %v3161_v54, 0.5 }
 0x55c   : > { %v1731_v56 = vsub.f32 1.0, %v3163_v3  ;;  %v3173_v25 = vadd.f32 -0.5, %v3163_v3  ;;  %vm1795_vm9 = vcmp.lt.f32.partialorder %v3163_v3, 0.5 }
 0x55d   : > { %v1732_v59 = vmin.f32 %v3161_v54, %v1730_v55  ;;  %v3177_v18 = vmul.f32 %v3170_v26, %v3170_v26 }
 0x55e   : > { %v1733_v60 = vmin.f32 %v3163_v3, %v1731_v56  ;;  %v3181_v34 = vmul.f32 %v3173_v25, %v3173_v25 }
 0x55f   : > { %2236 = vlog2.f32 %v1732_v59  ;;  %v1706_v52 = vmul.f32 -54.476097, %v3177_v18  ;;  %v1684_v62 = vmul.f32 -39.69683, %v3177_v18 }
 0x560   : > { %2238 = vlog2.f32 %v1733_v60  ;;  %v1707_v32 = vmul.f32 -54.476097, %v3181_v34  ;;  %v1685_v40 = vmul.f32 -39.69683, %v3181_v34 }
 0x561   : > { %v1708_v8 = vadd.f32 161.58583, %v1706_v52  ;;  %v1686_v47 = vadd.f32 220.9461, %v1684_v62 }
 0x562   : > { %v1709_v14 = vadd.f32 161.58583, %v1707_v32  ;;  %v1687_v35 = vadd.f32 220.9461, %v1685_v40 }
 0x563   : > { %v1710_v36 = vmul.f32 %v1708_v8, %v3177_v18  ;;  %v1688_v1 = vmul.f32 %v1686_v47, %v3177_v18 }
 0x564   : > { %v1711_v61 = vmul.f32 %v1709_v14, %v3181_v34  ;;  %v1689_v9 = vmul.f32 %v1687_v35, %v3181_v34 }
 0x565   : > { %v1712_v21 = vadd.f32 -155.69897, %v1710_v36 }
 0x566   : > { %v1713_v43 = vadd.f32 -155.69897, %v1711_v61 }
 0x567   : > { %v1714_v58 = vmul.f32 %v1712_v21, %v3177_v18 }
 0x568   : > { %v1715_v7 = vmul.f32 %v1713_v43, %v3181_v34 }
 0x569   : > { %v2237_v15 = vpop.eup %2236  ;;  %v1716_v45 = vadd.f32 66.801315, %v1714_v58 }
 0x56a   : > { %v2239_v0 = vpop.eup %2238  ;;  %v1735_v41 = vmul.f32 0.6931472, %v2237_v15  ;;  %v1717_v46 = vadd.f32 66.801315, %v1715_v7 }
 0x56b   : > { %v1737_v2 = vmul.f32 0.6931472, %v2239_v0  ;;  %v1718_v48 = vmul.f32 %v1716_v45, %v3177_v18 }
 0x56c   : > { %v1738_v6 = vmul.f32 -2.0, %v1735_v41  ;;  %v1719_v50 = vmul.f32 %v1717_v46, %v3181_v34  ;;  %v1690_v41 = vadd.f32 -275.9285, %v1688_v1 }
 0x56d   : > { %v1739_v12 = vmul.f32 -2.0, %v1737_v2  ;;  %v1720_v59 = vadd.f32 -13.280682, %v1718_v48  ;;  %v1691_v2 = vadd.f32 -275.9285, %v1689_v9 }
 0x56e   : > { %2240 = vrsqrt.f32 %v1738_v6  ;;  %vm1742_vm0 = vcmp.eq.f32.partialorder %v1738_v6, inf  ;;  %v1745_v37 = vand.u32 2147483648, %v1738_v6  ;;  %vm1744_vm1 = vcmp.eq.f32.partialorder %v1738_v6, 0.0 }
 0x56f   : > { %2242 = vrsqrt.f32 %v1739_v12  ;;  %vm1749_vm2 = vcmp.eq.f32.partialorder %v1739_v12, inf  ;;  %vm1751_vm6 = vcmp.eq.f32.partialorder %v1739_v12, 0.0  ;;  %v1752_v63 = vand.u32 2147483648, %v1739_v12 }
 0x570   : > { %v1721_v60 = vadd.f32 -13.280682, %v1719_v50  ;;  %v1800_v50 = vand.u32 2147483647, %v3170_v26 }
 0x572   : > { %vm1802_vm8 = vcmp.le.f32.partialorder %v1800_v50, 0.47575 }
 0x578   : > { %v2241_v13 = vpop.eup %2240 }
 0x579   : > { %v2243_v27 = vpop.eup %2242  ;;  %v1741_v28 = vmul.f32 %v2241_v13, %v1738_v6  ;;  %v1722_v13 = vmul.f32 %v1720_v59, %v3177_v18 }
 0x57a   : > { %v1748_v19 = vmul.f32 %v2243_v27, %v1739_v12  ;;  %v1723_v27 = vmul.f32 %v1721_v60, %v3181_v34 }
 0x57b   : > { %v1743_v38 = vsel %vm1742_vm0, %v1738_v6, %v1741_v28 }
 0x57c   : > { %v3185_v57 = vsel %vm1744_vm1, %v1745_v37, %v1743_v38  ;;  %v1750_v5 = vsel %vm1749_vm2, %v1739_v12, %v1748_v19  ;;  %v1692_v38 = vmul.f32 %v1690_v41, %v3177_v18  ;;  %v1693_v19 = vmul.f32 %v1691_v2, %v3181_v34 }
 0x57d   : > { %v1774_v10 = vmul.f32 0.007784696, %v3185_v57  ;;  %v3188_v4 = vsel %vm1751_vm6, %v1752_v63, %v1750_v5  ;;  %v1754_v44 = vmul.f32 -0.007784894, %v3185_v57  ;;  %v1724_v5 = vadd.f32 1.0, %v1722_v13 }
 0x57e   : > { %v1775_v22 = vmul.f32 0.007784696, %v3188_v4  ;;  %v1755_v23 = vmul.f32 -0.007784894, %v3188_v4  ;;  %v1725_v63 = vadd.f32 1.0, %v1723_v27 }
 0x57f   : > { %v1776_v53 = vadd.f32 0.32246712, %v1774_v10  ;;  %v1756_v11 = vadd.f32 -0.32239646, %v1754_v44  ;;  %v1694_v14 = vadd.f32 138.35776, %v1692_v38 }
 0x580   : > { %v1777_v31 = vadd.f32 0.32246712, %v1775_v22  ;;  %v1757_v17 = vadd.f32 -0.32239646, %v1755_v23 }
 0x581   : > { %v1778_v20 = vmul.f32 %v1776_v53, %v3185_v57  ;;  %v1758_v49 = vmul.f32 %v1756_v11, %v3185_v57  ;;  %v1695_v53 = vadd.f32 138.35776, %v1693_v19 }
 0x582   : > { %v1779_v24 = vmul.f32 %v1777_v31, %v3188_v4  ;;  %v1759_v55 = vmul.f32 %v1757_v17, %v3188_v4 }
 0x583   : > { %v1780_v33 = vadd.f32 2.4451342, %v1778_v20  ;;  %v1760_v15 = vadd.f32 -2.4007583, %v1758_v49  ;;  %v1696_v20 = vmul.f32 %v1694_v14, %v3177_v18  ;;  %v1697_v21 = vmul.f32 %v1695_v53, %v3181_v34 }
 0x584   : > { %v1781_v51 = vadd.f32 2.4451342, %v1779_v24  ;;  %v1761_v6 = vadd.f32 -2.4007583, %v1759_v55 }
 0x585   : > { %v1782_v30 = vmul.f32 %v1780_v33, %v3185_v57  ;;  %v1762_v28 = vmul.f32 %v1760_v15, %v3185_v57  ;;  %v1698_v33 = vadd.f32 -30.664799, %v1696_v20  ;;  %v1699_v58 = vadd.f32 -30.664799, %v1697_v21 }
 0x586   : > { %v1783_v0 = vmul.f32 %v1781_v51, %v3188_v4  ;;  %v1763_v52 = vmul.f32 %v1761_v6, %v3188_v4 }
 0x587   : > { %v1784_v56 = vadd.f32 3.7544086, %v1782_v30  ;;  %v1764_v10 = vadd.f32 -2.5497324, %v1762_v28  ;;  %v1700_v23 = vmul.f32 %v1698_v33, %v3177_v18  ;;  %v1701_v62 = vmul.f32 %v1699_v58, %v3181_v34 }
 0x588   : > { %v1785_v37 = vadd.f32 3.7544086, %v1783_v0  ;;  %v1765_v36 = vadd.f32 -2.5497324, %v1763_v52  ;;  %v1801_v18 = vand.u32 2147483647, %v3173_v25 }
 0x589   : > { %v1786_v12 = vmul.f32 %v1784_v56, %v3185_v57  ;;  %v1766_v61 = vmul.f32 %v1764_v10, %v3185_v57  ;;  %v1702_v30 = vadd.f32 2.5066283, %v1700_v23  ;;  %v1703_v45 = vadd.f32 2.5066283, %v1701_v62 }
 0x58a   : > { %v1787_v8 = vmul.f32 %v1785_v37, %v3188_v4  ;;  %v1767_v43 = vmul.f32 %v1765_v36, %v3188_v4  ;;  %vm1803_vm10 = vcmp.le.f32.partialorder %v1801_v18, 0.47575 }
 0x58b   : > { %v1788_v32 = vadd.f32 1.0, %v1786_v12  ;;  %v1768_v31 = vadd.f32 4.3746643, %v1766_v61  ;;  %v1704_v11 = vmul.f32 %v3170_v26, %v1702_v30  ;;  %v1705_v17 = vmul.f32 %v3173_v25, %v1703_v45 }
 0x58c   : > { %v1789_v22 = vadd.f32 1.0, %v1787_v8  ;;  %v1769_v7 = vadd.f32 4.3746643, %v1767_v43 }
 0x58d   : > { %2244 = vrcp.f32 %v1788_v32  ;;  %v1770_v44 = vmul.f32 %v1768_v31, %v3185_v57 }
 0x58e   : > { %2246 = vrcp.f32 %v1724_v5  ;;  %v1771_v40 = vmul.f32 %v1769_v7, %v3188_v4 }
 0x58f   : > { %2248 = vrcp.f32 %v1725_v63  ;;  %v1772_v24 = vadd.f32 2.938164, %v1770_v44 }
 0x590   : > { %2250 = vrcp.f32 %v1789_v22  ;;  %v1773_v47 = vadd.f32 2.938164, %v1771_v40 }
 0x597   : > { %v2245_v46 = vpop.eup %2244 }
 0x598   : > { %v2247_v35 = vpop.eup %2246  ;;  %v1791_v48 = vmul.f32 %v2245_v46, %v1772_v24 }
 0x599   : > { %v2249_v57 = vpop.eup %2248  ;;  %v1727_v49 = vmul.f32 %v2247_v35, %v1704_v11 }
 0x59a   : > { %v2251_v34 = vpop.eup %2250  ;;  %v1796_v4 = vsub.f32 0.0, %v1791_v48  ;;  %v1729_v1 = vmul.f32 %v2249_v57, %v1705_v17 }
 0x59b   : > { %v1793_v51 = vmul.f32 %v2251_v34, %v1773_v47 }
 0x59c   : > { %v1798_v9 = vsel %vm1794_vm7, %v1791_v48, %v1796_v4 }
 0x59d   : > { %v1797_v55 = vsub.f32 0.0, %v1793_v51  ;;  %v1804_v56 = vsel %vm1802_vm8, %v1727_v49, %v1798_v9 }
 0x59e   : > { %v1813_v59 = vmul.f32 %v1804_v56, %v2883_v29 }
 0x59f   : > { %v1799_v26 = vsel %vm1795_vm9, %v1793_v51, %v1797_v55 }
 0x5a0   : > { %v1805_v60 = vsel %vm1803_vm10, %v1729_v1, %v1799_v26 }
 0x5a1   : > { %v1814_v54 = vmul.f32 %v1805_v60, %v2883_v29 }
 0x5a3   : > { %v1817_v25 = vcombine.low %v1813_v59, %v1814_v54 }
 0x620   : > { %v1628_v15 = vpop.f32.mrb[14].mxu1 }
 0x621   : > { %v1629_v0 = vadd.f32 %v1628_v15, %v2889_v39  ;;  %v1630_v3 = vpop.f32.mrb[15].mxu1 }
 0x622   : > { %v1631_v41 = vadd.f32 %v1630_v3, %v2889_v39 }
 0x623   : > { %v1806_v2 = vmul.f32 %v1629_v0, %v2891_v42 }
 0x624   : > { %v1807_v6 = vmul.f32 %v1631_v41, %v2891_v42 }
 0x626   : > { %v1810_v12 = vcombine.low %v1806_v2, %v1807_v6 }
 0x628   : > { %v1812_v13 = vadd.f32 %v1810_v12, %v3064_v16 }
 0x62a   : > { %v1819_v27 = vadd.f32 %v1817_v25, %v1812_v13 }
 0x62c   : > { %1820 = vst [vmem:[%s2661_s0] sm:$0xff] %v1819_v27 }
 0x62d   : > { %2330 = shalt.err (!%p2327_p1)
}
 0x62e   : > { %s2331_s2 = scalar_lea.hbm %s3243_s21, 128  ;;  %s2335_s8 = scalar_lea.hbm %s3307_s9, 256 }
 0x62f   : > { %p2332_p2 = scmp.ne.s32.totalorder %s3243_s21, %s2331_s2  ;;  %p2336_p9 = scmp.lt.u32.totalorder %s3243_s21, %s3307_s9 }
 0x630   : > { %p2337_p5 = scmp.lt.u32.totalorder %s2335_s8, %s2331_s2  ;;  %p2339_p8 = scmp.lt.u32.totalorder %s2331_s2, %s3243_s21 }
 0x631   : > { %p2333_p4 = pnand %p2332_p2, %p2590_p12 }
 0x632   : > { %p2338_p6 = por %p2337_p5, %p2336_p9 }
 0x633   : > { %p2334_p13 = pneg %p2333_p4 }
 0x634   : > { %p2340_p10 = por %p2339_p8, %p2338_p6 }
 0x636   : > { %p2341_p0 = pnand %p2340_p10, %p2334_p13 }
 0x638   : > { %2344 = shalt.err (!%p2341_p0)
}
 0x639   : > { %2062 = dma.vmem_to_hbm [thread:$0]  (%p2590_p12), %s3245_s1, 128, %s3243_s21, %s1822_s12  }
 0x63a PF: > { %p2084_p3 = scmp.ge.s32.totalorder %s2423_s3, 2  ;;  %s1850_s22 = sand.u32 1, %s2395_s13  }
 0x63b   : > { %p3340_p7 = scmp.ne.s32.totalorder %s3323_s24, 0  ;;  %s1851_s10 = scalar_lea.sflag [#allocation6], %s1850_s22 }
 0x63d   : > { %p2076_p11 = pnand %p2084_p3, %p3340_p7 }
 0x63f   : > { %2390 = dma.done.wait (!%p2076_p11), %s1851_s10, 128  }
 0x640   : > { %2392 = vsyncadd (!%p2076_p11), %s1851_s10, 4294967168  ;;  %s29_s3 = sadd.s32 1, %s2423_s3   ;;  %s3341_s16 = sld [smem:[#allocation16_spill]] }
 0x641   : > { %p26_p1 = scmp.ge.s32.totalorder %s29_s3, 10   ;;  %s3342_s2 = sld [smem:[#allocation17_spill]] }
 0x642   : > { %s3343_s11 = sld [smem:[#allocation18_spill]]  ;;  %s3344_s13 = smov %s2399_s14 }
 0x643   : > { %s3345_s14 = smov %s2403_s15  ;;  %s3346_s15 = smov %s2613_s27 }
 0x644   : > { %s3347_s17 = smov %s2419_s18  ;;  %28 = sbr.rel (!%p26_p1) target bundleno = 17 (0x11), region = 115 }
 0x648   : > { %s3348_s18 = smov %s3343_s11 }
 0x64b   :  { %1856 = vsyncpa [#allocation5], 1 }
 0x64c   :  { %1858 = vsyncpa [#allocation5 + $0x1], 1 }
 0x64d   :  { %1859 = vsyncpa [#allocation6], 1 }
 0x64e   :  { %1861 = vsyncpa [#allocation6 + $0x1], 1 }
 0x64f   :  { %1862 = vsyncpa [#allocation7], 1 }
 0x650   :  { %1864 = vsyncpa [#allocation7 + $0x1], 1 }
 0x651   :  { %1865 = vsyncpa [#allocation9], 1 }

</bundles_post_ra>
